<compile_context>
chip_gen: v5e
topology: v5e:2x2
jax: 0.10.0
libtpu: 0.0.40
codegen_flags: <defaults>
</compile_context>

<pallas_src>
import functools
import numpy as np
import jax
import jax.numpy as jnp
from jax.experimental import pallas as pl
from jax.experimental.pallas import tpu as pltpu


def _round_up(x, m):
    return (x + m - 1) // m * m


# ------------------------------ Pallas kernels -------------------------------

def _cbl_kernel(p_ref, w_ref, b_ref, o_ref):
    """One M-tile of LeakyReLU(patches @ W + b): a single MXU matmul per step."""
    y = jnp.dot(p_ref[...], w_ref[...], preferred_element_type=jnp.float32)
    y = y + b_ref[...]
    o_ref[...] = jnp.where(y > 0, y, 0.1 * y)


def _resx_fused_kernel(p_ref, w0_ref, b0_ref, w1_ref, b1_ref, w2_ref, b2_ref,
                       m_ref, o_ref, y_scr, h_scr, *, wp):
    """Whole ResX block for one batch image, everything resident in VMEM.

    p_ref : (Hp*Wp, KK*Cin) bf16  downsample im2col patches, embedded in the
                                  zero-ring ResUnit frame (ring rows are zero).
    w0    : (KK*Cin, C) bf16      downsample weights (BN folded)  b0: (1, C)  f32
    w1    : (C, C2)    bf16       ResUnit 1x1 weights             b1: (1, C2) f32
    w2    : (9, C2, C) bf16       ResUnit 3x3 weights per tap     b2: (1, C)  f32
    m_ref : (Hp*Wp, 1) f32        1.0 on interior pixels, 0.0 on the pad ring
    o_ref : (Ho*Wp, C) f32        output in the "wide row" frame (cols >= Wo junk)
    y_scr : (Hp*Wp, C)      f32   downsample output, padded frame
    h_scr : (Hp*Wp + 8, C2) f32   1x1 output, padded frame (+ slack for slabs)
    """
    hpwp = y_scr.shape[0]
    howp, cout = o_ref.shape

    # ---- downsample CBL: one big matmul (tap loop folded into contraction) ----
    y = jnp.dot(p_ref[...], w0_ref[...], preferred_element_type=jnp.float32)
    y = y + b0_ref[...]
    y = jnp.where(y > 0, y, 0.1 * y)
    y_scr[...] = y                      # stays in VMEM; never written to HBM

    # ---- ResUnit 1x1 CBL (pointwise), then zero the padding ring ---------------
    h = jnp.dot(y.astype(jnp.bfloat16), w1_ref[...],
                preferred_element_type=jnp.float32)
    h = h + b1_ref[...]
    h = jnp.where(h > 0, h, 0.1 * h)
    h = h * m_ref[...]                  # ring -> 0 so the 3x3 sees zero padding
    h_scr[...] = jnp.zeros(h_scr.shape, h_scr.dtype)
    h_scr[pl.ds(0, hpwp), :] = h

    # ---- ResUnit 3x3 CBL: 9 shifted row-slab matmuls straight from VMEM --------
    # Tap (kh, kw) of output pixel (r, c) is h_pad[r+kh, c+kw], i.e. flat row
    # kh*Wp + kw + (r*Wp + c) of the padded, row-flattened h.  Columns c >= Wo
    # of the accumulator are junk and get sliced off on the host.
    acc = jnp.zeros((howp, cout), jnp.float32)
    for kh in range(3):
        for kw in range(3):
            slab = h_scr[pl.ds(kh * wp + kw, howp), :].astype(jnp.bfloat16)
            acc = acc + jnp.dot(slab, w2_ref[kh * 3 + kw],
                                preferred_element_type=jnp.float32)
    z = acc + b2_ref[...]
    z = jnp.where(z > 0, z, 0.1 * z)

    # ---- residual add: y interior, read back from the padded frame -------------
    o_ref[...] = y_scr[pl.ds(wp + 1, howp), :] + z


# ------------------------------- host glue -----------------------------------

def _extract_patches(x_nhwc, k, stride, pad):
    """(N,H,W,Cin) -> (N,Ho,Wo,K*K*Cin), tap-major / cin-minor (matches fold_bn)."""
    n, h, w, c = x_nhwc.shape
    xp = jnp.pad(x_nhwc, ((0, 0), (pad, pad), (pad, pad), (0, 0)))
    ho = (h + 2 * pad - k) // stride + 1
    wo = (w + 2 * pad - k) // stride + 1
    taps = []
    for kh in range(k):
        for kw in range(k):
            taps.append(xp[:, kh: kh + (ho - 1) * stride + 1: stride,
                              kw: kw + (wo - 1) * stride + 1: stride, :])
    p = jnp.stack(taps, axis=3).reshape(n, ho, wo, k * k * c)
    return p, ho, wo


def cbl_conv(x_nhwc, w_flat, bias, k, stride, pad):
    """Standalone CBL (n == 0 path): M-tiled single-matmul Pallas kernel."""
    patches, ho, wo = _extract_patches(x_nhwc, k, stride, pad)
    nb = x_nhwc.shape[0]
    kkcin, cout = w_flat.shape
    m = nb * ho * wo
    p2 = patches.reshape(m, kkcin).astype(jnp.bfloat16)
    tm = min(512, _round_up(m, 8))
    m_pad = _round_up(m, tm)
    if m_pad != m:
        p2 = jnp.pad(p2, ((0, m_pad - m), (0, 0)))
    out = pl.pallas_call(
        _cbl_kernel,
        out_shape=jax.ShapeDtypeStruct((m_pad, cout), jnp.float32),
        grid=(m_pad // tm,),
        in_specs=[pl.BlockSpec((tm, kkcin), lambda i: (i, 0)),
                  pl.BlockSpec((kkcin, cout), lambda i: (0, 0)),
                  pl.BlockSpec((1, cout), lambda i: (0, 0))],
        out_specs=pl.BlockSpec((tm, cout), lambda i: (i, 0)),
        compiler_params=pltpu.CompilerParams(
            dimension_semantics=("parallel",)),
    )(p2, w_flat.astype(jnp.bfloat16), bias.reshape(1, cout).astype(jnp.float32))
    return out[:m].reshape(nb, ho, wo, cout)


def resx_fused(x_nhwc, w0, b0, w1, b1, w2t, b2, k, stride, pad):
    """Fused downsample CBL + ResUnit.  Returns (N, Ho, Wo, C) float32."""
    patches, ho, wo = _extract_patches(x_nhwc, k, stride, pad)
    nb = x_nhwc.shape[0]
    kkcin = patches.shape[-1]
    cout = w0.shape[1]
    c2 = w1.shape[1]
    hp, wp = ho + 2, wo + 2
    hpwp, howp = hp * wp, ho * wp

    # Embed patches in the ResUnit's zero-ring frame so one padded row-flattened
    # coordinate system serves y, h, the 3x3 slabs and the residual.
    pp = jnp.pad(patches.astype(jnp.bfloat16), ((0, 0), (1, 1), (1, 1), (0, 0)))
    pp = pp.reshape(nb, hpwp, kkcin)

    ri = np.arange(hpwp) // wp
    ci = np.arange(hpwp) % wp
    interior = (ri >= 1) & (ri <= ho) & (ci >= 1) & (ci <= wo)
    mask = jnp.asarray(interior.astype(np.float32).reshape(hpwp, 1))

    args = (pp,
            w0.astype(jnp.bfloat16), b0.reshape(1, cout).astype(jnp.float32),
            w1.astype(jnp.bfloat16), b1.reshape(1, c2).astype(jnp.float32),
            w2t.astype(jnp.bfloat16), b2.reshape(1, cout).astype(jnp.float32),
            mask)

    flops = nb * 2 * (hpwp * kkcin * cout + hpwp * cout * c2
                      + 9 * howp * c2 * cout)
    bytes_accessed = (pp.size * 2 + (w0.size + w1.size + w2t.size) * 2
                      + (b0.size + b1.size + b2.size) * 4 + mask.size * 4
                      + nb * howp * cout * 4)

    out = pl.pallas_call(
        functools.partial(_resx_fused_kernel, wp=wp),
        out_shape=jax.ShapeDtypeStruct((nb, howp, cout), jnp.float32),
        grid=(nb,),
        in_specs=[
            pl.BlockSpec((None, hpwp, kkcin), lambda i: (i, 0, 0)),
            pl.BlockSpec((kkcin, cout), lambda i: (0, 0)),
            pl.BlockSpec((1, cout), lambda i: (0, 0)),
            pl.BlockSpec((cout, c2), lambda i: (0, 0)),
            pl.BlockSpec((1, c2), lambda i: (0, 0)),
            pl.BlockSpec((9, c2, cout), lambda i: (0, 0, 0)),
            pl.BlockSpec((1, cout), lambda i: (0, 0)),
            pl.BlockSpec((hpwp, 1), lambda i: (0, 0)),
        ],
        out_specs=pl.BlockSpec((None, howp, cout), lambda i: (i, 0, 0)),
        scratch_shapes=[pltpu.VMEM((hpwp, cout), jnp.float32),
                        pltpu.VMEM((hpwp + 8, c2), jnp.float32)],
        compiler_params=pltpu.CompilerParams(
            dimension_semantics=("parallel",),
            vmem_limit_bytes=48 * 1024 * 1024),
        cost_estimate=pl.CostEstimate(flops=flops, transcendentals=0,
                                      bytes_accessed=bytes_accessed),
    )(*args)

    # drop the junk columns of the "wide row" frame -> (N, Ho, Wo, C)
    return out.reshape(nb, ho, wp, cout)[:, :, :wo, :]


# --------------------------- parameters & folding ----------------------------

def init_cbl_params(key, cin, cout, k):
    ks = jax.random.split(key, 6)
    return dict(
        k=k,
        w=0.1 * jax.random.normal(ks[0], (cout, cin, k, k), jnp.float32),   # OIHW
        b=0.1 * jax.random.normal(ks[1], (cout,), jnp.float32),
        gamma=1.0 + 0.1 * jax.random.normal(ks[2], (cout,), jnp.float32),
        beta=0.1 * jax.random.normal(ks[3], (cout,), jnp.float32),
        mean=0.1 * jax.random.normal(ks[4], (cout,), jnp.float32),
        var=jax.random.uniform(ks[5], (cout,), jnp.float32, 0.5, 1.5),
    )


def fold_bn(p, eps=1e-5):
    """Fold eval-mode BN into the conv; weight laid out as (K*K*Cin, Cout)."""
    # TODO(synk): PyTorch default train() mode would use batch statistics; we
    # implement standard eval-mode BN with running stats (folded).
    scale = p["gamma"] / jnp.sqrt(p["var"] + eps)
    w = p["w"] * scale[:, None, None, None]                  # (Cout, Cin, K, K)
    b = (p["b"] - p["mean"]) * scale + p["beta"]
    cout, cin, k, _ = p["w"].shape
    w_flat = jnp.transpose(w, (2, 3, 1, 0)).reshape(k * k * cin, cout)
    return w_flat, b


def init_resx_params(key, n, cin, cout, k):
    k1, k2, k3 = jax.random.split(key, 3)
    params = {"down": init_cbl_params(k1, cin, cout, k)}
    if n >= 1:
        params["ru1"] = init_cbl_params(k2, cout, cout // 2, 1)
        params["ru2"] = init_cbl_params(k3, cout // 2, cout, 3)
    return params


# ------------------------------- ResX forward --------------------------------

def resx_forward(x_nchw, params, n, k, stride, pad):
    x = jnp.transpose(x_nchw, (0, 2, 3, 1))                  # NCHW -> NHWC
    w0, b0 = fold_bn(params["down"])
    if n < 1:
        y = cbl_conv(x, w0, b0, k, stride, pad)
    else:
        # PyTorch name collision keeps exactly one ResUnit regardless of n.
        w1, b1 = fold_bn(params["ru1"])                      # (C, C//2)
        w2, b2 = fold_bn(params["ru2"])                      # (9*C//2, C)
        c2 = w1.shape[1]
        w2t = w2.reshape(9, c2, w2.shape[1])                 # (9, C//2, C)
        y = resx_fused(x, w0, b0, w1, b1, w2t, b2, k, stride, pad)
    return jnp.transpose(y, (0, 3, 1, 2))                    # NHWC -> NCHW


# ---------------------------- pure-JAX reference ------------------------------

def _cbl_ref(x_nhwc, p, stride, pad, eps=1e-5):
    w_hwio = jnp.transpose(p["w"], (2, 3, 1, 0))
    y = jax.lax.conv_general_dilated(
        x_nhwc, w_hwio, window_strides=(stride, stride),
        padding=((pad, pad), (pad, pad)),
        dimension_numbers=("NHWC", "HWIO", "NHWC"))
    y = y + p["b"]
    scale = p["gamma"] / jnp.sqrt(p["var"] + eps)
    y = (y - p["mean"]) * scale + p["beta"]
    return jnp.where(y > 0, y, 0.1 * y)


def resx_ref(x_nchw, params, n, k, stride, pad):
    x = jnp.transpose(x_nchw, (0, 2, 3, 1))
    y = _cbl_ref(x, params["down"], stride, pad)
    if n >= 1:
        h = _cbl_ref(y, params["ru1"], 1, 0)
        y = y + _cbl_ref(h, params["ru2"], 1, 1)
    return jnp.transpose(y, (0, 3, 1, 2))


# ------------------------------------ main ------------------------------------

if __name__ == "__main__":
    key = jax.random.PRNGKey(0)
    kx, kp = jax.random.split(key)

    # ResX(n=1, 4, 8, 3, 2, 1): downsample CBL(4->8, k=3, s=2, p=1) + one ResUnit(8)
    N, CIN, H, W = 2, 4, 16, 16
    COUT, K, STRIDE, PAD, N_RES = 8, 3, 2, 1, 1

    x = jax.random.normal(kx, (N, CIN, H, W), jnp.float32)
    params = init_resx_params(kp, N_RES, CIN, COUT, K)

    fwd = jax.jit(functools.partial(resx_forward, n=N_RES, k=K,
                                    stride=STRIDE, pad=PAD))
    out = jax.block_until_ready(fwd(x, params))
    ref = resx_ref(x, params, N_RES, K, STRIDE, PAD)
    # bf16 activations/weights with f32 accumulation -> relaxed tolerance
    np.testing.assert_allclose(np.asarray(out), np.asarray(ref),
                               atol=3e-2, rtol=3e-2)
    assert out.shape == (N, COUT, H // STRIDE, W // STRIDE)

    # also exercise the n == 0 (no ResUnit) standalone-CBL path
    fwd0 = jax.jit(functools.partial(resx_forward, n=0, k=K,
                                     stride=STRIDE, pad=PAD))
    out0 = jax.block_until_ready(fwd0(x, params))
    ref0 = resx_ref(x, params, 0, K, STRIDE, PAD)
    np.testing.assert_allclose(np.asarray(out0), np.asarray(ref0),
                               atol=3e-2, rtol=3e-2)

    print("KERNEL_OK")
</pallas_src>

<mosaic_0001>
module attributes {stable_mosaic.version = 11 : i64} {
  func.func @_resx_fused_kernel(%arg0: i32, %arg1: memref<1x100x36xbf16, #tpu.memory_space<vmem>>, %arg2: memref<36x8xbf16, #tpu.memory_space<vmem>>, %arg3: memref<1x8xf32, #tpu.memory_space<vmem>>, %arg4: memref<8x4xbf16, #tpu.memory_space<vmem>>, %arg5: memref<1x4xf32, #tpu.memory_space<vmem>>, %arg6: memref<9x4x8xbf16, #tpu.memory_space<vmem>>, %arg7: memref<1x8xf32, #tpu.memory_space<vmem>>, %arg8: memref<100x1xf32, #tpu.memory_space<vmem>>, %arg9: memref<1x80x8xf32, #tpu.memory_space<vmem>>, %arg10: memref<100x8xf32, #tpu.memory_space<vmem>>, %arg11: memref<108x4xf32, #tpu.memory_space<vmem>>) attributes {dimension_semantics = [#tpu.dimension_semantics<parallel>], iteration_bounds = array<i64: 2>, scalar_prefetch = 0 : i64, scratch_operands = 2 : i64, tpu.core_type = #tpu.core_type<tc>, window_params = [{transform_indices = @transform_0, window_bounds = array<i64: 1, 100, 36>}, {pipeline_mode = #tpu.pipeline_mode<synchronous>, transform_indices = @transform_1, window_bounds = array<i64: 36, 8>}, {pipeline_mode = #tpu.pipeline_mode<synchronous>, transform_indices = @transform_2, window_bounds = array<i64: 1, 8>}, {pipeline_mode = #tpu.pipeline_mode<synchronous>, transform_indices = @transform_3, window_bounds = array<i64: 8, 4>}, {pipeline_mode = #tpu.pipeline_mode<synchronous>, transform_indices = @transform_4, window_bounds = array<i64: 1, 4>}, {pipeline_mode = #tpu.pipeline_mode<synchronous>, transform_indices = @transform_5, window_bounds = array<i64: 9, 4, 8>}, {pipeline_mode = #tpu.pipeline_mode<synchronous>, transform_indices = @transform_6, window_bounds = array<i64: 1, 8>}, {pipeline_mode = #tpu.pipeline_mode<synchronous>, transform_indices = @transform_7, window_bounds = array<i64: 100, 1>}, {transform_indices = @transform_8, window_bounds = array<i64: 1, 80, 8>}]} {
    %c0 = arith.constant 0 : index
    %c0_0 = arith.constant 0 : index
    %c0_1 = arith.constant 0 : index
    %0 = vector.load %arg1[%c0, %c0_0, %c0_1] : memref<1x100x36xbf16, #tpu.memory_space<vmem>>, vector<1x100x36xbf16>
    %1 = vector.shape_cast %0 : vector<1x100x36xbf16> to vector<100x36xbf16>
    %c0_2 = arith.constant 0 : index
    %c0_3 = arith.constant 0 : index
    %2 = vector.load %arg2[%c0_2, %c0_3] : memref<36x8xbf16, #tpu.memory_space<vmem>>, vector<36x8xbf16>
    %cst = arith.constant dense<0.000000e+00> : vector<100x8xf32>
    %3 = tpu.matmul %1, %2, %cst {dimension_numbers = #tpu.dot_dimension_numbers<[1], [0], [0], [1], [0, 0, 1, 1], [], []>} : vector<100x36xbf16>, vector<36x8xbf16>, vector<100x8xf32> -> vector<100x8xf32>
    %c0_4 = arith.constant 0 : index
    %c0_5 = arith.constant 0 : index
    %4 = vector.load %arg3[%c0_4, %c0_5] : memref<1x8xf32, #tpu.memory_space<vmem>>, vector<1x8xf32>
    %5 = vector.broadcast %4 : vector<1x8xf32> to vector<100x8xf32>
    %6 = arith.addf %3, %5 : vector<100x8xf32>
    %cst_6 = arith.constant 0.000000e+00 : f32
    %7 = vector.broadcast %cst_6 : f32 to vector<100x8xf32>
    %8 = arith.cmpf ogt, %6, %7 : vector<100x8xf32>
    %cst_7 = arith.constant 1.000000e-01 : f32
    %9 = vector.broadcast %cst_7 : f32 to vector<100x8xf32>
    %10 = arith.mulf %9, %6 : vector<100x8xf32>
    %11 = arith.select %8, %6, %10 : vector<100x8xi1>, vector<100x8xf32>
    %c0_8 = arith.constant 0 : index
    %c0_9 = arith.constant 0 : index
    %12 = vector.load %arg10[%c0_8, %c0_9] : memref<100x8xf32, #tpu.memory_space<vmem>>, vector<100x8xf32>
    tpu.vector_store %arg10[%c0_8, %c0_9], %11 {strides = array<i32>} : memref<100x8xf32, #tpu.memory_space<vmem>>, vector<100x8xf32>,
    %13 = arith.truncf %11 : vector<100x8xf32> to vector<100x8xbf16>
    %c0_10 = arith.constant 0 : index
    %c0_11 = arith.constant 0 : index
    %14 = vector.load %arg4[%c0_10, %c0_11] : memref<8x4xbf16, #tpu.memory_space<vmem>>, vector<8x4xbf16>
    %cst_12 = arith.constant dense<0.000000e+00> : vector<100x4xf32>
    %15 = tpu.matmul %13, %14, %cst_12 {dimension_numbers = #tpu.dot_dimension_numbers<[1], [0], [0], [1], [0, 0, 1, 1], [], []>} : vector<100x8xbf16>, vector<8x4xbf16>, vector<100x4xf32> -> vector<100x4xf32>
    %c0_13 = arith.constant 0 : index
    %c0_14 = arith.constant 0 : index
    %16 = vector.load %arg5[%c0_13, %c0_14] : memref<1x4xf32, #tpu.memory_space<vmem>>, vector<1x4xf32>
    %17 = vector.broadcast %16 : vector<1x4xf32> to vector<100x4xf32>
    %18 = arith.addf %15, %17 : vector<100x4xf32>
    %cst_15 = arith.constant 0.000000e+00 : f32
    %19 = vector.broadcast %cst_15 : f32 to vector<100x4xf32>
    %20 = arith.cmpf ogt, %18, %19 : vector<100x4xf32>
    %cst_16 = arith.constant 1.000000e-01 : f32
    %21 = vector.broadcast %cst_16 : f32 to vector<100x4xf32>
    %22 = arith.mulf %21, %18 : vector<100x4xf32>
    %23 = arith.select %20, %18, %22 : vector<100x4xi1>, vector<100x4xf32>
    %c0_17 = arith.constant 0 : index
    %c0_18 = arith.constant 0 : index
    %24 = vector.load %arg8[%c0_17, %c0_18] : memref<100x1xf32, #tpu.memory_space<vmem>>, vector<100x1xf32>
    %25 = vector.broadcast %24 : vector<100x1xf32> to vector<100x4xf32>
    %26 = arith.mulf %23, %25 : vector<100x4xf32>
    %cst_19 = arith.constant 0.000000e+00 : f32
    %27 = vector.broadcast %cst_19 : f32 to vector<108x4xf32>
    %c0_20 = arith.constant 0 : index
    %c0_21 = arith.constant 0 : index
    %28 = vector.load %arg11[%c0_20, %c0_21] : memref<108x4xf32, #tpu.memory_space<vmem>>, vector<108x4xf32>
    tpu.vector_store %arg11[%c0_20, %c0_21], %27 {strides = array<i32>} : memref<108x4xf32, #tpu.memory_space<vmem>>, vector<108x4xf32>,
    %c0_22 = arith.constant 0 : index
    %c0_23 = arith.constant 0 : index
    %29 = vector.load %arg11[%c0_22, %c0_23] : memref<108x4xf32, #tpu.memory_space<vmem>>, vector<100x4xf32>
    tpu.vector_store %arg11[%c0_22, %c0_23], %26 {strides = array<i32>} : memref<108x4xf32, #tpu.memory_space<vmem>>, vector<100x4xf32>,
    %cst_24 = arith.constant 0.000000e+00 : f32
    %30 = vector.broadcast %cst_24 : f32 to vector<80x8xf32>
    %c0_25 = arith.constant 0 : index
    %c0_26 = arith.constant 0 : index
    %31 = vector.load %arg11[%c0_25, %c0_26] : memref<108x4xf32, #tpu.memory_space<vmem>>, vector<80x4xf32>
    %32 = arith.truncf %31 : vector<80x4xf32> to vector<80x4xbf16>
    %c0_27 = arith.constant 0 : index
    %c0_28 = arith.constant 0 : index
    %c0_29 = arith.constant 0 : index
    %33 = vector.load %arg6[%c0_27, %c0_28, %c0_29] : memref<9x4x8xbf16, #tpu.memory_space<vmem>>, vector<1x4x8xbf16>
    %34 = vector.shape_cast %33 : vector<1x4x8xbf16> to vector<4x8xbf16>
    %cst_30 = arith.constant dense<0.000000e+00> : vector<80x8xf32>
    %35 = tpu.matmul %32, %34, %cst_30 {dimension_numbers = #tpu.dot_dimension_numbers<[1], [0], [0], [1], [0, 0, 1, 1], [], []>} : vector<80x4xbf16>, vector<4x8xbf16>, vector<80x8xf32> -> vector<80x8xf32>
    %36 = arith.addf %30, %35 : vector<80x8xf32>
    %c1 = arith.constant 1 : index
    %c0_31 = arith.constant 0 : index
    %37 = vector.load %arg11[%c1, %c0_31] : memref<108x4xf32, #tpu.memory_space<vmem>>, vector<80x4xf32>
    %38 = arith.truncf %37 : vector<80x4xf32> to vector<80x4xbf16>
    %c1_32 = arith.constant 1 : index
    %c0_33 = arith.constant 0 : index
    %c0_34 = arith.constant 0 : index
    %39 = vector.load %arg6[%c1_32, %c0_33, %c0_34] : memref<9x4x8xbf16, #tpu.memory_space<vmem>>, vector<1x4x8xbf16>
    %40 = vector.shape_cast %39 : vector<1x4x8xbf16> to vector<4x8xbf16>
    %cst_35 = arith.constant dense<0.000000e+00> : vector<80x8xf32>
    %41 = tpu.matmul %38, %40, %cst_35 {dimension_numbers = #tpu.dot_dimension_numbers<[1], [0], [0], [1], [0, 0, 1, 1], [], []>} : vector<80x4xbf16>, vector<4x8xbf16>, vector<80x8xf32> -> vector<80x8xf32>
    %42 = arith.addf %36, %41 : vector<80x8xf32>
    %c2 = arith.constant 2 : index
    %c0_36 = arith.constant 0 : index
    %43 = vector.load %arg11[%c2, %c0_36] : memref<108x4xf32, #tpu.memory_space<vmem>>, vector<80x4xf32>
    %44 = arith.truncf %43 : vector<80x4xf32> to vector<80x4xbf16>
    %c2_37 = arith.constant 2 : index
    %c0_38 = arith.constant 0 : index
    %c0_39 = arith.constant 0 : index
    %45 = vector.load %arg6[%c2_37, %c0_38, %c0_39] : memref<9x4x8xbf16, #tpu.memory_space<vmem>>, vector<1x4x8xbf16>
    %46 = vector.shape_cast %45 : vector<1x4x8xbf16> to vector<4x8xbf16>
    %cst_40 = arith.constant dense<0.000000e+00> : vector<80x8xf32>
    %47 = tpu.matmul %44, %46, %cst_40 {dimension_numbers = #tpu.dot_dimension_numbers<[1], [0], [0], [1], [0, 0, 1, 1], [], []>} : vector<80x4xbf16>, vector<4x8xbf16>, vector<80x8xf32> -> vector<80x8xf32>
    %48 = arith.addf %42, %47 : vector<80x8xf32>
    %c10 = arith.constant 10 : index
    %c0_41 = arith.constant 0 : index
    %49 = vector.load %arg11[%c10, %c0_41] : memref<108x4xf32, #tpu.memory_space<vmem>>, vector<80x4xf32>
    %50 = arith.truncf %49 : vector<80x4xf32> to vector<80x4xbf16>
    %c3 = arith.constant 3 : index
    %c0_42 = arith.constant 0 : index
    %c0_43 = arith.constant 0 : index
    %51 = vector.load %arg6[%c3, %c0_42, %c0_43] : memref<9x4x8xbf16, #tpu.memory_space<vmem>>, vector<1x4x8xbf16>
    %52 = vector.shape_cast %51 : vector<1x4x8xbf16> to vector<4x8xbf16>
    %cst_44 = arith.constant dense<0.000000e+00> : vector<80x8xf32>
    %53 = tpu.matmul %50, %52, %cst_44 {dimension_numbers = #tpu.dot_dimension_numbers<[1], [0], [0], [1], [0, 0, 1, 1], [], []>} : vector<80x4xbf16>, vector<4x8xbf16>, vector<80x8xf32> -> vector<80x8xf32>
    %54 = arith.addf %48, %53 : vector<80x8xf32>
    %c11 = arith.constant 11 : index
    %c0_45 = arith.constant 0 : index
    %55 = vector.load %arg11[%c11, %c0_45] : memref<108x4xf32, #tpu.memory_space<vmem>>, vector<80x4xf32>
    %56 = arith.truncf %55 : vector<80x4xf32> to vector<80x4xbf16>
    %c4 = arith.constant 4 : index
    %c0_46 = arith.constant 0 : index
    %c0_47 = arith.constant 0 : index
    %57 = vector.load %arg6[%c4, %c0_46, %c0_47] : memref<9x4x8xbf16, #tpu.memory_space<vmem>>, vector<1x4x8xbf16>
    %58 = vector.shape_cast %57 : vector<1x4x8xbf16> to vector<4x8xbf16>
    %cst_48 = arith.constant dense<0.000000e+00> : vector<80x8xf32>
    %59 = tpu.matmul %56, %58, %cst_48 {dimension_numbers = #tpu.dot_dimension_numbers<[1], [0], [0], [1], [0, 0, 1, 1], [], []>} : vector<80x4xbf16>, vector<4x8xbf16>, vector<80x8xf32> -> vector<80x8xf32>
    %60 = arith.addf %54, %59 : vector<80x8xf32>
    %c12 = arith.constant 12 : index
    %c0_49 = arith.constant 0 : index
    %61 = vector.load %arg11[%c12, %c0_49] : memref<108x4xf32, #tpu.memory_space<vmem>>, vector<80x4xf32>
    %62 = arith.truncf %61 : vector<80x4xf32> to vector<80x4xbf16>
    %c5 = arith.constant 5 : index
    %c0_50 = arith.constant 0 : index
    %c0_51 = arith.constant 0 : index
    %63 = vector.load %arg6[%c5, %c0_50, %c0_51] : memref<9x4x8xbf16, #tpu.memory_space<vmem>>, vector<1x4x8xbf16>
    %64 = vector.shape_cast %63 : vector<1x4x8xbf16> to vector<4x8xbf16>
    %cst_52 = arith.constant dense<0.000000e+00> : vector<80x8xf32>
    %65 = tpu.matmul %62, %64, %cst_52 {dimension_numbers = #tpu.dot_dimension_numbers<[1], [0], [0], [1], [0, 0, 1, 1], [], []>} : vector<80x4xbf16>, vector<4x8xbf16>, vector<80x8xf32> -> vector<80x8xf32>
    %66 = arith.addf %60, %65 : vector<80x8xf32>
    %c20 = arith.constant 20 : index
    %c0_53 = arith.constant 0 : index
    %67 = vector.load %arg11[%c20, %c0_53] : memref<108x4xf32, #tpu.memory_space<vmem>>, vector<80x4xf32>
    %68 = arith.truncf %67 : vector<80x4xf32> to vector<80x4xbf16>
    %c6 = arith.constant 6 : index
    %c0_54 = arith.constant 0 : index
    %c0_55 = arith.constant 0 : index
    %69 = vector.load %arg6[%c6, %c0_54, %c0_55] : memref<9x4x8xbf16, #tpu.memory_space<vmem>>, vector<1x4x8xbf16>
    %70 = vector.shape_cast %69 : vector<1x4x8xbf16> to vector<4x8xbf16>
    %cst_56 = arith.constant dense<0.000000e+00> : vector<80x8xf32>
    %71 = tpu.matmul %68, %70, %cst_56 {dimension_numbers = #tpu.dot_dimension_numbers<[1], [0], [0], [1], [0, 0, 1, 1], [], []>} : vector<80x4xbf16>, vector<4x8xbf16>, vector<80x8xf32> -> vector<80x8xf32>
    %72 = arith.addf %66, %71 : vector<80x8xf32>
    %c21 = arith.constant 21 : index
    %c0_57 = arith.constant 0 : index
    %73 = vector.load %arg11[%c21, %c0_57] : memref<108x4xf32, #tpu.memory_space<vmem>>, vector<80x4xf32>
    %74 = arith.truncf %73 : vector<80x4xf32> to vector<80x4xbf16>
    %c7 = arith.constant 7 : index
    %c0_58 = arith.constant 0 : index
    %c0_59 = arith.constant 0 : index
    %75 = vector.load %arg6[%c7, %c0_58, %c0_59] : memref<9x4x8xbf16, #tpu.memory_space<vmem>>, vector<1x4x8xbf16>
    %76 = vector.shape_cast %75 : vector<1x4x8xbf16> to vector<4x8xbf16>
    %cst_60 = arith.constant dense<0.000000e+00> : vector<80x8xf32>
    %77 = tpu.matmul %74, %76, %cst_60 {dimension_numbers = #tpu.dot_dimension_numbers<[1], [0], [0], [1], [0, 0, 1, 1], [], []>} : vector<80x4xbf16>, vector<4x8xbf16>, vector<80x8xf32> -> vector<80x8xf32>
    %78 = arith.addf %72, %77 : vector<80x8xf32>
    %c22 = arith.constant 22 : index
    %c0_61 = arith.constant 0 : index
    %79 = vector.load %arg11[%c22, %c0_61] : memref<108x4xf32, #tpu.memory_space<vmem>>, vector<80x4xf32>
    %80 = arith.truncf %79 : vector<80x4xf32> to vector<80x4xbf16>
    %c8 = arith.constant 8 : index
    %c0_62 = arith.constant 0 : index
    %c0_63 = arith.constant 0 : index
    %81 = vector.load %arg6[%c8, %c0_62, %c0_63] : memref<9x4x8xbf16, #tpu.memory_space<vmem>>, vector<1x4x8xbf16>
    %82 = vector.shape_cast %81 : vector<1x4x8xbf16> to vector<4x8xbf16>
    %cst_64 = arith.constant dense<0.000000e+00> : vector<80x8xf32>
    %83 = tpu.matmul %80, %82, %cst_64 {dimension_numbers = #tpu.dot_dimension_numbers<[1], [0], [0], [1], [0, 0, 1, 1], [], []>} : vector<80x4xbf16>, vector<4x8xbf16>, vector<80x8xf32> -> vector<80x8xf32>
    %84 = arith.addf %78, %83 : vector<80x8xf32>
    %c0_65 = arith.constant 0 : index
    %c0_66 = arith.constant 0 : index
    %85 = vector.load %arg7[%c0_65, %c0_66] : memref<1x8xf32, #tpu.memory_space<vmem>>, vector<1x8xf32>
    %86 = vector.broadcast %85 : vector<1x8xf32> to vector<80x8xf32>
    %87 = arith.addf %84, %86 : vector<80x8xf32>
    %cst_67 = arith.constant 0.000000e+00 : f32
    %88 = vector.broadcast %cst_67 : f32 to vector<80x8xf32>
    %89 = arith.cmpf ogt, %87, %88 : vector<80x8xf32>
    %cst_68 = arith.constant 1.000000e-01 : f32
    %90 = vector.broadcast %cst_68 : f32 to vector<80x8xf32>
    %91 = arith.mulf %90, %87 : vector<80x8xf32>
    %92 = arith.select %89, %87, %91 : vector<80x8xi1>, vector<80x8xf32>
    %c11_69 = arith.constant 11 : index
    %c0_70 = arith.constant 0 : index
    %93 = vector.load %arg10[%c11_69, %c0_70] : memref<100x8xf32, #tpu.memory_space<vmem>>, vector<80x8xf32>
    %94 = arith.addf %93, %92 : vector<80x8xf32>
    %c0_71 = arith.constant 0 : index
    %c0_72 = arith.constant 0 : index
    %c0_73 = arith.constant 0 : index
    %95 = vector.load %arg9[%c0_71, %c0_72, %c0_73] : memref<1x80x8xf32, #tpu.memory_space<vmem>>, vector<1x80x8xf32>
    %96 = vector.shape_cast %95 : vector<1x80x8xf32> to vector<80x8xf32>
    %97 = vector.shape_cast %94 : vector<80x8xf32> to vector<1x80x8xf32>
    tpu.vector_store %arg9[%c0_71, %c0_72, %c0_73], %97 {strides = array<i32>} : memref<1x80x8xf32, #tpu.memory_space<vmem>>, vector<1x80x8xf32>,
    return
  }
  func.func @transform_0(%arg0: i32) -> (i32, i32, i32) {
    %c0_i32 = arith.constant 0 : i32
    %c0_i32_0 = arith.constant 0 : i32
    %c0_i32_1 = arith.constant 0 : i32
    return %arg0, %c0_i32, %c0_i32_0 : i32, i32, i32
  }
  func.func @transform_1(%arg0: i32) -> (i32, i32) {
    %c0_i32 = arith.constant 0 : i32
    %c0_i32_0 = arith.constant 0 : i32
    %c0_i32_1 = arith.constant 0 : i32
    return %c0_i32, %c0_i32_0 : i32, i32
  }
  func.func @transform_2(%arg0: i32) -> (i32, i32) {
    %c0_i32 = arith.constant 0 : i32
    %c0_i32_0 = arith.constant 0 : i32
    %c0_i32_1 = arith.constant 0 : i32
    return %c0_i32, %c0_i32_0 : i32, i32
  }
  func.func @transform_3(%arg0: i32) -> (i32, i32) {
    %c0_i32 = arith.constant 0 : i32
    %c0_i32_0 = arith.constant 0 : i32
    %c0_i32_1 = arith.constant 0 : i32
    return %c0_i32, %c0_i32_0 : i32, i32
  }
  func.func @transform_4(%arg0: i32) -> (i32, i32) {
    %c0_i32 = arith.constant 0 : i32
    %c0_i32_0 = arith.constant 0 : i32
    %c0_i32_1 = arith.constant 0 : i32
    return %c0_i32, %c0_i32_0 : i32, i32
  }
  func.func @transform_5(%arg0: i32) -> (i32, i32, i32) {
    %c0_i32 = arith.constant 0 : i32
    %c0_i32_0 = arith.constant 0 : i32
    %c0_i32_1 = arith.constant 0 : i32
    %c0_i32_2 = arith.constant 0 : i32
    return %c0_i32, %c0_i32_0, %c0_i32_1 : i32, i32, i32
  }
  func.func @transform_6(%arg0: i32) -> (i32, i32) {
    %c0_i32 = arith.constant 0 : i32
    %c0_i32_0 = arith.constant 0 : i32
    %c0_i32_1 = arith.constant 0 : i32
    return %c0_i32, %c0_i32_0 : i32, i32
  }
  func.func @transform_7(%arg0: i32) -> (i32, i32) {
    %c0_i32 = arith.constant 0 : i32
    %c0_i32_0 = arith.constant 0 : i32
    %c0_i32_1 = arith.constant 0 : i32
    return %c0_i32, %c0_i32_0 : i32, i32
  }
  func.func @transform_8(%arg0: i32) -> (i32, i32, i32) {
    %c0_i32 = arith.constant 0 : i32
    %c0_i32_0 = arith.constant 0 : i32
    %c0_i32_1 = arith.constant 0 : i32
    return %arg0, %c0_i32, %c0_i32_0 : i32, i32, i32
  }
}

</mosaic_0001>

<bundles_post_ra>
// kernel: resx_forward.1
= control target key start
LH: loop header
LB: loop body
LE: loop exit
PB: predicated region body
PF: predicated region fallthrough
CT: control target
= control target key end

     0   :  { %s1748_s27 = smov 0   ;;  %s2137_s0 = inlined_call_operand.vmem [shape: bf16[2,100,36], index: 0, kind: input, shape index: {}]   ;;  %s2138_s1 = inlined_call_operand.vmem [shape: bf16[36,8], index: 1, kind: input, shape index: {}]   ;;  %s2139_s2 = inlined_call_operand.vmem [shape: f32[1,8], index: 2, kind: input, shape index: {}]   ;;  %s2140_s3 = inlined_call_operand.vmem [shape: bf16[8,4], index: 3, kind: input, shape index: {}]   ;;  %s2141_s4 = inlined_call_operand.vmem [shape: f32[1,4], index: 4, kind: input, shape index: {}]   ;;  %s2142_s5 = inlined_call_operand.vmem [shape: bf16[9,4,8], index: 5, kind: input, shape index: {}]   ;;  %s2143_s6 = inlined_call_operand.vmem [shape: f32[1,8], index: 6, kind: input, shape index: {}]   ;;  %s2144_s7 = inlined_call_operand.vmem [shape: f32[100,1], index: 7, kind: input, shape index: {}]   ;;  %s2145_s8 = inlined_call_operand.vmem [shape: f32[2,80,8], index: 8, kind: output, shape index: {}]  }
   0x1 LB: > { %s1558_s28 = sadd.s32 4294967295, %s1699_s27   ;;  %p1562_p0 = scmp.ge.s32.totalorder %s1699_s27, 1  ;;  %s1699_s27 = sphi %s1748_s27, %s18_s27  }
   0x2   : > { %p262_p1 = scmp.lt.s32.totalorder %s1699_s27, 3 }
   0x4   : > { %p263_p2 = pnand %p1562_p0, %p262_p1 }
   0x5   : > { %p296_p3 = scmp.lt.s32.totalorder (!%p263_p2), %s1558_s28, 1 }
   0x6   : > { %266 = sbr.rel (%p263_p2) target bundleno = 706 (0x2c2), region = 52 }
   0xb   : > { %v324_v0 = vld [vmem:[%s2138_s1 + $0x10] sm:$0x3]  ;;  %vm399_vm0 = vcmask 1041408   ;;  %v507_v2 = vld [vmem:[%s2140_s3] sm:$0xf]  ;;  %vm533_vm1 = vcmask 1043456  }
   0xc   : > { %v371_v1 = vunpack.c.l.b16 %v324_v0  ;;  %s2147_s28 = smov (!%p296_p3, %s1558_s28), 1  ;;  %v535_v3 = vsel %vm533_vm1, %v507_v2, 0  ;;  %v1673_v6 = vld [vmem:[%s2138_s1 + $0x8] sm:$0xff]  ;;  %v1672_v7 = vld [vmem:[%s2138_s1] sm:$0xff]  ;;  %vm377_vm2 = vcmask 293888   ;;  %v1701_v18 = vmov 0  }
   0xd   : > { %1674 = vmatpush.bf16.msra.mxu1 %v535_v3  ;;  %s1675_s13 = smul.u32 52, %s2147_s28  ;;  %v619_v17 = vld [vmem:[%s2144_s7] sm:$0xff]  ;;  %1687 = vset.pattern.permute.xlu0 %v1701_v18  ;;  %v620_v19 = vld [vmem:[%s2144_s7 + $0x8] sm:$0xff]  ;;  %v621_v20 = vld [vmem:[%s2144_s7 + $0x10] sm:$0xff]  ;;  %vm485_vm4 = vcmask 64512  }
   0xe   : > { %v374_v4 = vpack.c.b16 %v371_v1, %v371_v1  ;;  %1688 = vset.pattern.permute.xlu1 %v1701_v18  ;;  %634 = vperm.xlu0 %1687, %v619_v17   ;;  %v625_v21 = vld [vmem:[%s2144_s7 + $0x30] sm:$0xff]  ;;  %v622_v22 = vld [vmem:[%s2144_s7 + $0x18] sm:$0xff]  ;;  %v1800_v23 = vld [vmem:[%s2139_s2] ss:$0 sm:$0xff]  ;;  %s1676_s9 = smul.u32 80, %s2147_s28 }
   0xf   : > { %s300_s18 = scalar_lea.vmem %s2137_s0, %s1675_s13  ;;  %1689 = vset.pattern.permute.xlu2 %v1701_v18  ;;  %644 = vperm.xlu1 %1688, %v621_v20   ;;  %v628_v24 = vld [vmem:[%s2144_s7 + $0x48] sm:$0xff]  ;;  %v626_v28 = vld [vmem:[%s2144_s7 + $0x38] sm:$0xff]  ;;  %v631_v30 = vld [vmem:[%s2144_s7 + $0x60] sm:$0xf] }
  0x10   : > { %v401_v5 = vsel %vm399_vm0, %v374_v4, 0  ;;  %v1666_v8 = vld [vmem:[%s300_s18] sm:$0xff]  ;;  %v1667_v9 = vld [vmem:[%s300_s18 + $0x8] sm:$0xff]  ;;  %v1668_v10 = vld [vmem:[%s300_s18 + $0x10] sm:$0xff]  ;;  %s2088_s12 = scalar_lea.vmem %s2145_s8, %s1676_s9 }
  0x11   : > { %408 = vmatpush.bf16.msra.mxu0 %v401_v5  ;;  %v1669_v11 = vld [vmem:[%s300_s18 + $0x18] sm:$0xff]  ;;  %v1670_v12 = vld [vmem:[%s300_s18 + $0x20] sm:$0xff]  ;;  %v1671_v13 = vld [vmem:[%s300_s18 + $0x28] sm:$0xff] }
  0x12   : > { %v319_v14 = vld [vmem:[%s300_s18 + $0x30] sm:$0x3]  ;;  %v623_v44 = vld [vmem:[%s2144_s7 + $0x20] sm:$0xff]  ;;  %v624_v50 = vld [vmem:[%s2144_s7 + $0x28] sm:$0xff] }
  0x13   : > { %v354_v15 = vunpack.c.l.b16 %v319_v14  ;;  %v629_v34 = vld [vmem:[%s2144_s7 + $0x50] sm:$0xff]  ;;  %654 = vperm.xlu2 %1689, %v623_v44   ;;  %v627_v55 = vld [vmem:[%s2144_s7 + $0x40] sm:$0xff]  ;;  %v630_v61 = vld [vmem:[%s2144_s7 + $0x58] sm:$0xff] }
  0x15   : > { %409 = vmatpush.bf16.msra.mxu0 %v1673_v6  ;;  %v361_v16 = vpack.c.b16 %v354_v15, %v354_v15 }
  0x16   : > { %639 = vperm.xlu0 %1687, %v620_v19  }
  0x17   : > { %649 = vperm.xlu1 %1688, %v622_v22  }
  0x19   : > { %410 = vmatpush.bf16.msra.mxu0 %v1672_v7 }
  0x1b   : > { %659 = vperm.xlu2 %1689, %v624_v50  }
  0x1c   : > { %1597 = vmatmul.msk.bf16.vlgmr.msra.gmra.mxu0 %vm377_vm2, %v1666_v8 }
  0x1d   : > { %544 = vmatpush.bf16.msrb.mxu0 %v535_v3 }
  0x1e   : > { %664 = vperm.xlu0 %1687, %v625_v21  }
  0x1f   : > { %669 = vperm.xlu1 %1688, %v626_v28  }
  0x23   : > { %674 = vperm.xlu2 %1689, %v627_v55  }
  0x26   : > { %679 = vperm.xlu0 %1687, %v628_v24  }
  0x27   : > { %684 = vperm.xlu1 %1688, %v629_v34  }
  0x2b   : > { %689 = vperm.xlu2 %1689, %v630_v61  }
  0x2c   : > { %1598 = vmatmul.msk.bf16.gmra.mxu0 %vm377_vm2, %v1667_v9 }
  0x2e   : > { %694 = vperm.xlu0 %1687, %v631_v30  }
  0x3c   : > { %1599 = vmatmul.msk.bf16.gmra.mxu0 %vm377_vm2, %v1668_v10 }
  0x4c   : > { %1600 = vmatmul.msk.bf16.gmra.mxu0 %vm377_vm2, %v1669_v11 }
  0x5c   : > { %1601 = vmatmul.msk.bf16.gmra.mxu0 %vm377_vm2, %v1670_v12 }
  0x6c   : > { %1602 = vmatmul.msk.bf16.gmra.mxu0 %vm377_vm2, %v1671_v13 }
  0x7c   : > { %1603 = vmatmul.msk.bf16.gmra.mxu0 %vm377_vm2, %v361_v16  ;;  %vm710_vm2 = vcmask 31744  }
  0x99   : > { %v412_v25 = vpop.f32.mrf.mxu0 }
  0x9a   : > { %v413_v26 = vadd.f32 %v1800_v23, %v412_v25 }
  0x9c   : > { %vm446_vm3 = vcmp.gt.f32.partialorder %v413_v26, 0.0  ;;  %v459_v27 = vmul.f32 0.1, %v413_v26 }
  0x9e   : > { %v472_v29 = vsel %vm446_vm3, %v413_v26, %v459_v27 }
  0xa1   : > { %v414_v31 = vpop.f32.mrf.mxu0 }
  0xa2   : > { %v415_v32 = vadd.f32 %v1800_v23, %v414_v31  ;;  %v1877_v31 = vld [vmem:[%s2141_s4] ss:$0 sm:$0xff] }
  0xa4   : > { %vm447_vm5 = vcmp.gt.f32.partialorder %v415_v32, 0.0  ;;  %v460_v33 = vmul.f32 0.1, %v415_v32 }
  0xa6   : > { %v473_v35 = vsel %vm447_vm5, %v415_v32, %v460_v33  ;;  %v1611_v32 = vld [vmem:[%s2142_s5 + $0x2] sm:$0x3] }
  0xa7   : > { %487 = vst.msk [vmem:[#allocation2 + $0x8] sm:$0xff] %vm485_vm4, %v473_v35  ;;  %v500_v36 = vpack.c.bf16 %v473_v35, %v472_v29  ;;  %v1702_v29 = vmov 0.0   ;;  %v788_v33 = vsel %vm399_vm0, %v1611_v32, 0 }
  0xa8   : > { %711 = vst.msk [vmem:[#allocation3] sm:$0xff] %vm710_vm2, %v1702_v29  ;;  %797 = vmatpush.bf16.msra.mxu2 %v788_v33 }
  0xa9   : > { %v417_v37 = vpop.f32.mrf.mxu0  ;;  %1604 = vmatmul.msk.bf16.vlgmr.msrb.gmra.mxu0 %vm485_vm4, %v500_v36  ;;  %712 = vst.msk [vmem:[#allocation3 + $0x8] sm:$0xff] %vm710_vm2, %v1702_v29  ;;  %v635_v36 = vpop.permute.xlu0 %634 }
  0xaa   : > { %v418_v38 = vadd.f32 %v1800_v23, %v417_v37  ;;  %713 = vst.msk [vmem:[#allocation3 + $0x10] sm:$0xff] %vm710_vm2, %v1702_v29 }
  0xab   : > { %714 = vst.msk [vmem:[#allocation3 + $0x18] sm:$0xff] %vm710_vm2, %v1702_v29 }
  0xac   : > { %vm448_vm6 = vcmp.gt.f32.partialorder %v418_v38, 0.0  ;;  %v461_v39 = vmul.f32 0.1, %v418_v38  ;;  %715 = vst.msk [vmem:[#allocation3 + $0x20] sm:$0xff] %vm710_vm2, %v1702_v29 }
  0xad   : > { %716 = vst.msk [vmem:[#allocation3 + $0x28] sm:$0xff] %vm710_vm2, %v1702_v29 }
  0xae   : > { %v474_v40 = vsel %vm448_vm6, %v418_v38, %v461_v39  ;;  %717 = vst.msk [vmem:[#allocation3 + $0x30] sm:$0xff] %vm710_vm2, %v1702_v29  ;;  %v1634_v39 = vld [vmem:[%s2142_s5 + $0x8] sm:$0x3] }
  0xaf   : > { %488 = vst.msk [vmem:[#allocation2 + $0x10] sm:$0xff] %vm485_vm4, %v474_v40 }
  0xb0   : > { %718 = vst.msk [vmem:[#allocation3 + $0x38] sm:$0xff] %vm710_vm2, %v1702_v29 }
  0xb1   : > { %v419_v41 = vpop.f32.mrf.mxu0  ;;  %719 = vst.msk [vmem:[#allocation3 + $0x40] sm:$0xff] %vm710_vm2, %v1702_v29 }
  0xb2   : > { %v420_v42 = vadd.f32 %v1800_v23, %v419_v41  ;;  %720 = vst.msk [vmem:[#allocation3 + $0x48] sm:$0xff] %vm710_vm2, %v1702_v29 }
  0xb3   : > { %721 = vst.msk [vmem:[#allocation3 + $0x50] sm:$0xff] %vm710_vm2, %v1702_v29 }
  0xb4   : > { %vm449_vm7 = vcmp.gt.f32.partialorder %v420_v42, 0.0  ;;  %v462_v43 = vmul.f32 0.1, %v420_v42  ;;  %722 = vst.msk [vmem:[#allocation3 + $0x58] sm:$0xff] %vm710_vm2, %v1702_v29 }
  0xb5   : > { %723 = vst.msk [vmem:[#allocation3 + $0x60] sm:$0xff] %vm710_vm2, %v1702_v29 }
  0xb6   : > { %v475_v45 = vsel %vm449_vm7, %v420_v42, %v462_v43  ;;  %v1067_v42 = vsel %vm399_vm0, %v1634_v39, 0 }
  0xb7   : > { %489 = vst.msk [vmem:[#allocation2 + $0x18] sm:$0xff] %vm485_vm4, %v475_v45  ;;  %v501_v46 = vpack.c.bf16 %v475_v45, %v474_v40  ;;  %v1640_v40 = vld [vmem:[%s2142_s5 + $0xa] sm:$0x3]  ;;  %1076 = vmatpush.bf16.msrb.mxu1 %v1067_v42  ;;  %v1622_v45 = vld [vmem:[%s2142_s5 + $0x4] sm:$0x3] }
  0xb8   : > { %v1146_v43 = vsel %vm399_vm0, %v1640_v40, 0 }
  0xb9   : > { %v422_v47 = vpop.f32.mrf.mxu0  ;;  %1605 = vmatmul.msk.bf16.gmra.mxu0 %vm485_vm4, %v501_v46  ;;  %v1628_v46 = vld [vmem:[%s2142_s5 + $0x6] sm:$0x3] }
  0xba   : > { %v423_v48 = vadd.f32 %v1800_v23, %v422_v47  ;;  %1155 = vmatpush.bf16.msra.mxu0 %v1146_v43 }
  0xbc   : > { %vm450_vm8 = vcmp.gt.f32.partialorder %v423_v48, 0.0  ;;  %v463_v49 = vmul.f32 0.1, %v423_v48 }
  0xbe   : > { %v476_v51 = vsel %vm450_vm8, %v423_v48, %v463_v49  ;;  %v909_v48 = vsel %vm399_vm0, %v1622_v45, 0  ;;  %v988_v49 = vsel %vm399_vm0, %v1628_v46, 0 }
  0xbf   : > { %490 = vst.msk [vmem:[#allocation2 + $0x20] sm:$0xff] %vm485_vm4, %v476_v51  ;;  %918 = vmatpush.bf16.msrb.mxu2 %v909_v48 }
  0xc1   : > { %v424_v52 = vpop.f32.mrf.mxu0 }
  0xc2   : > { %v425_v53 = vadd.f32 %v1800_v23, %v424_v52 }
  0xc4   : > { %vm451_vm9 = vcmp.gt.f32.partialorder %v425_v53, 0.0  ;;  %v464_v54 = vmul.f32 0.1, %v425_v53 }
  0xc6   : > { %v477_v56 = vsel %vm451_vm9, %v425_v53, %v464_v54 }
  0xc7   : > { %491 = vst.msk [vmem:[#allocation2 + $0x28] sm:$0xff] %vm485_vm4, %v477_v56  ;;  %v502_v57 = vpack.c.bf16 %v477_v56, %v476_v51  ;;  %v640_v51 = vpop.permute.xlu0 %639  ;;  %v645_v56 = vpop.permute.xlu1 %644 }
  0xc9   : > { %v427_v58 = vpop.f32.mrf.mxu0  ;;  %1606 = vmatmul.msk.bf16.vlgmr.msra.gmra.mxu1 %vm485_vm4, %v502_v57 }
  0xca   : > { %v428_v59 = vadd.f32 %v1800_v23, %v427_v58 }
  0xcc   : > { %vm452_vm10 = vcmp.gt.f32.partialorder %v428_v59, 0.0  ;;  %v465_v60 = vmul.f32 0.1, %v428_v59 }
  0xce   : > { %v478_v62 = vsel %vm452_vm10, %v428_v59, %v465_v60 }
  0xcf   : > { %492 = vst.msk [vmem:[#allocation2 + $0x30] sm:$0xff] %vm485_vm4, %v478_v62 }
  0xd1   : > { %v429_v63 = vpop.f32.mrf.mxu0 }
  0xd2   : > { %v430_v0 = vadd.f32 %v1800_v23, %v429_v63 }
  0xd4   : > { %vm453_vm11 = vcmp.gt.f32.partialorder %v430_v0, 0.0  ;;  %v466_v1 = vmul.f32 0.1, %v430_v0 }
  0xd6   : > { %v479_v2 = vsel %vm453_vm11, %v430_v0, %v466_v1 }
  0xd7   : > { %493 = vst.msk [vmem:[#allocation2 + $0x38] sm:$0xff] %vm485_vm4, %v479_v2  ;;  %v503_v3 = vpack.c.bf16 %v479_v2, %v478_v62  ;;  %v650_v2 = vpop.permute.xlu1 %649 }
  0xd9   : > { %v432_v4 = vpop.f32.mrf.mxu0  ;;  %1607 = vmatmul.msk.bf16.gmra.mxu1 %vm485_vm4, %v503_v3 }
  0xda   : > { %v433_v5 = vadd.f32 %v1800_v23, %v432_v4 }
  0xdc   : > { %vm454_vm12 = vcmp.gt.f32.partialorder %v433_v5, 0.0  ;;  %v467_v6 = vmul.f32 0.1, %v433_v5 }
  0xde   : > { %v480_v7 = vsel %vm454_vm12, %v433_v5, %v467_v6 }
  0xdf   : > { %494 = vst.msk [vmem:[#allocation2 + $0x40] sm:$0xff] %vm485_vm4, %v480_v7 }
  0xe1   : > { %v434_v8 = vpop.f32.mrf.mxu0 }
  0xe2   : > { %v435_v9 = vadd.f32 %v1800_v23, %v434_v8 }
  0xe4   : > { %vm455_vm13 = vcmp.gt.f32.partialorder %v435_v9, 0.0  ;;  %v468_v10 = vmul.f32 0.1, %v435_v9 }
  0xe6   : > { %v481_v11 = vsel %vm455_vm13, %v435_v9, %v468_v10  ;;  %v655_v10 = vpop.permute.xlu2 %654  ;;  %vm724_vm13 = vcmask 27648  }
  0xe7   : > { %495 = vst.msk [vmem:[#allocation2 + $0x48] sm:$0xff] %vm485_vm4, %v481_v11  ;;  %v504_v12 = vpack.c.bf16 %v481_v11, %v480_v7 }
  0xe9   : > { %v437_v13 = vpop.f32.mrf.mxu0  ;;  %1608 = vmatmul.msk.bf16.gmra.mxu1 %vm485_vm4, %v504_v12 }
  0xea   : > { %v438_v14 = vadd.f32 %v1800_v23, %v437_v13 }
  0xec   : > { %vm456_vm14 = vcmp.gt.f32.partialorder %v438_v14, 0.0  ;;  %v469_v15 = vmul.f32 0.1, %v438_v14 }
  0xee   : > { %v482_v16 = vsel %vm456_vm14, %v438_v14, %v469_v15 }
  0xef   : > { %496 = vst.msk [vmem:[#allocation2 + $0x50] sm:$0xff] %vm485_vm4, %v482_v16 }
  0xf1   : > { %v439_v17 = vpop.f32.mrf.mxu0 }
  0xf2   : > { %v440_v18 = vadd.f32 %v1800_v23, %v439_v17 }
  0xf4   : > { %vm457_vm15 = vcmp.gt.f32.partialorder %v440_v18, 0.0  ;;  %v470_v19 = vmul.f32 0.1, %v440_v18 }
  0xf6   : > { %v483_v20 = vsel %vm457_vm15, %v440_v18, %v470_v19 }
  0xf7   : > { %497 = vst.msk [vmem:[#allocation2 + $0x58] sm:$0xff] %vm485_vm4, %v483_v20  ;;  %v505_v21 = vpack.c.bf16 %v483_v20, %v482_v16 }
  0xf9   : > { %1609 = vmatmul.msk.bf16.gmra.mxu1 %vm485_vm4, %v505_v21  ;;  %v442_v22 = vpop.f32.mrf.mxu0 }
  0xfa   : > { %v443_v24 = vadd.f32 %v1800_v23, %v442_v22  ;;  %v754_v23 = vld [vmem:[%s2142_s5] sm:$0x3] }
  0xfb   : > { %v840_v30 = vsel %vm399_vm0, %v754_v23, 0 }
  0xfc   : > { %vm458_vm1 = vcmp.gt.f32.partialorder %v443_v24, 0.0  ;;  %v471_v25 = vmul.f32 0.1, %v443_v24  ;;  %849 = vmatpush.bf16.msra.mxu3 %v840_v30 }
  0xfe   : > { %v484_v26 = vsel %vm458_vm1, %v443_v24, %v471_v25 }
  0xff   : > { %v506_v28 = vpack.c.bf16 %v484_v26, %v484_v26 }
 0x100   : > { %997 = vmatpush.bf16.msrb.mxu3 %v988_v49 }
 0x101   : > { %v444_v27 = vpop.f32.mrf.mxu0 }
 0x102   : > { %v660_v27 = vpop.permute.xlu2 %659 }
 0x109   : > { %1610 = vmatmul.msk.bf16.gmra.mxu1 %vm485_vm4, %v506_v28 }
 0x126   : > { %v546_v34 = vpop.f32.mrf.mxu0 }
 0x127   : > { %v547_v35 = vadd.f32 %v1877_v31, %v546_v34 }
 0x129   : > { %vm580_vm3 = vcmp.gt.f32.partialorder %v547_v35, 0.0  ;;  %v593_v37 = vmul.f32 0.1, %v547_v35 }
 0x12b   : > { %v606_v38 = vsel %vm580_vm3, %v547_v35, %v593_v37 }
 0x12c   : > { %v697_v41 = vmul.f32 %v635_v36, %v606_v38  ;;  %v665_v38 = vpop.permute.xlu0 %664 }
 0x12e   : > { %726 = vst.msk [vmem:[#allocation3] sm:$0xff] %vm710_vm2, %v697_v41  ;;  %v548_v44 = vpop.f32.mrf.mxu0 }
 0x12f   : > { %v549_v47 = vadd.f32 %v1877_v31, %v548_v44 }
 0x131   : > { %vm581_vm5 = vcmp.gt.f32.partialorder %v549_v47, 0.0  ;;  %v594_v50 = vmul.f32 0.1, %v549_v47 }
 0x133   : > { %v607_v52 = vsel %vm581_vm5, %v549_v47, %v594_v50 }
 0x134   : > { %v698_v53 = vmul.f32 %v640_v51, %v607_v52  ;;  %v670_v52 = vpop.permute.xlu1 %669 }
 0x135   : > { %v739_v60 = vld [vmem:[#allocation3] sm:$0xff] }
 0x136   : > { %727 = vst.msk [vmem:[#allocation3 + $0x8] sm:$0xff] %vm710_vm2, %v698_v53  ;;  %v551_v54 = vpop.f32.mrf.mxu0 }
 0x137   : > { %v552_v55 = vadd.f32 %v1877_v31, %v551_v54 }
 0x139   : > { %vm582_vm6 = vcmp.gt.f32.partialorder %v552_v55, 0.0  ;;  %v595_v57 = vmul.f32 0.1, %v552_v55 }
 0x13b   : > { %v608_v58 = vsel %vm582_vm6, %v552_v55, %v595_v57 }
 0x13c   : > { %v699_v59 = vmul.f32 %v645_v56, %v608_v58 }
 0x13d   : > { %v740_v61 = vld [vmem:[#allocation3 + $0x8] sm:$0xff] }
 0x13e   : > { %728 = vst.msk [vmem:[#allocation3 + $0x10] sm:$0xff] %vm710_vm2, %v699_v59  ;;  %v553_v62 = vpop.f32.mrf.mxu0  ;;  %v749_v63 = vpack.c.bf16 %v740_v61, %v739_v60  ;;  %v755_v5 = vld [vmem:[#allocation3 + $0x1] sm:$0xff] }
 0x13f   : > { %v554_v0 = vadd.f32 %v1877_v31, %v553_v62 }
 0x140   : > { %1617 = vmatmul.msk.bf16.vlgmr.msra.gmra.mxu3 %vm710_vm2, %v749_v63  ;;  %v675_v63 = vpop.permute.xlu2 %674 }
 0x141   : > { %vm583_vm7 = vcmp.gt.f32.partialorder %v554_v0, 0.0  ;;  %v596_v1 = vmul.f32 0.1, %v554_v0 }
 0x143   : > { %v609_v3 = vsel %vm583_vm7, %v554_v0, %v596_v1 }
 0x144   : > { %v700_v4 = vmul.f32 %v650_v2, %v609_v3 }
 0x145   : > { %v756_v6 = vld [vmem:[#allocation3 + $0x9] sm:$0xff] }
 0x146   : > { %729 = vst.msk [vmem:[#allocation3 + $0x18] sm:$0xff] %vm710_vm2, %v700_v4  ;;  %v556_v7 = vpop.f32.mrf.mxu1  ;;  %v765_v8 = vpack.c.bf16 %v756_v6, %v755_v5  ;;  %v741_v14 = vld [vmem:[#allocation3 + $0x10] sm:$0xff] }
 0x147   : > { %v557_v9 = vadd.f32 %v1877_v31, %v556_v7  ;;  %v1034_v15 = vld [vmem:[#allocation3 + $0xb] sm:$0xff] }
 0x148   : > { %1612 = vmatmul.msk.bf16.vlgmr.msra.gmra.mxu2 %vm710_vm2, %v765_v8  ;;  %v1113_v16 = vld [vmem:[#allocation3 + $0xc] sm:$0xff] }
 0x149   : > { %vm584_vm8 = vcmp.gt.f32.partialorder %v557_v9, 0.0  ;;  %v597_v11 = vmul.f32 0.1, %v557_v9 }
 0x14b   : > { %v610_v12 = vsel %vm584_vm8, %v557_v9, %v597_v11 }
 0x14c   : > { %v701_v13 = vmul.f32 %v655_v10, %v610_v12 }
 0x14d   : > { %v742_v17 = vld [vmem:[#allocation3 + $0x18] sm:$0xff] }
 0x14e   : > { %v1035_v18 = vld [vmem:[#allocation3 + $0x13] sm:$0xff]  ;;  %730 = vst.msk [vmem:[#allocation3 + $0x20] sm:$0xff] %vm710_vm2, %v701_v13  ;;  %v558_v20 = vpop.f32.mrf.mxu1  ;;  %v750_v21 = vpack.c.bf16 %v742_v17, %v741_v14  ;;  %v680_v13 = vpop.permute.xlu0 %679 }
 0x14f   : > { %v1910_v19 = vld [vmem:[#allocation3 + $0x14] sm:$0xff]  ;;  %v1044_v22 = vpack.c.bf16 %v1035_v18, %v1034_v15  ;;  %v559_v25 = vadd.f32 %v1877_v31, %v558_v20 }
 0x150   : > { %v1123_v24 = vpack.c.bf16 %v1910_v19, %v1113_v16  ;;  %1618 = vmatmul.msk.bf16.gmra.mxu3 %vm710_vm2, %v750_v21  ;;  %v757_v23 = vld [vmem:[#allocation3 + $0x11] sm:$0xff] }
 0x151   : > { %1635 = vmatmul.msk.bf16.vlgmr.msrb.gmra.mxu1 %vm710_vm2, %v1044_v22  ;;  %vm585_vm9 = vcmp.gt.f32.partialorder %v559_v25, 0.0  ;;  %v598_v26 = vmul.f32 0.1, %v559_v25 }
 0x152   : > { %1641 = vmatmul.msk.bf16.vlgmr.msra.gmra.mxu0 %vm710_vm2, %v1123_v24 }
 0x153   : > { %v611_v28 = vsel %vm585_vm9, %v559_v25, %v598_v26  ;;  %v1646_v25 = vld [vmem:[%s2142_s5 + $0xc] sm:$0x3]  ;;  %v1652_v26 = vld [vmem:[%s2142_s5 + $0xe] sm:$0x3] }
 0x154   : > { %v702_v29 = vmul.f32 %v660_v27, %v611_v28  ;;  %v1658_v27 = vld [vmem:[%s2142_s5 + $0x10] sm:$0x3] }
 0x155   : > { %v758_v30 = vld [vmem:[#allocation3 + $0x19] sm:$0xff] }
 0x156   : > { %731 = vst.msk [vmem:[#allocation3 + $0x28] sm:$0xff] %vm710_vm2, %v702_v29  ;;  %v561_v32 = vpop.f32.mrf.mxu1  ;;  %v766_v33 = vpack.c.bf16 %v758_v30, %v757_v23  ;;  %v1919_v34 = vld [vmem:[#allocation3 + $0x1c] sm:$0xff]  ;;  %v1225_v29 = vsel %vm399_vm0, %v1646_v25, 0  ;;  %v1304_v23 = vsel %vm399_vm0, %v1652_v26, 0  ;;  %v1383_v30 = vsel %vm399_vm0, %v1658_v27, 0 }
 0x157   : > { %v562_v35 = vadd.f32 %v1877_v31, %v561_v32  ;;  %v1202_v36 = vpack.c.bf16 %v1919_v34, %v1910_v19  ;;  %v743_v41 = vld [vmem:[#allocation3 + $0x20] sm:$0xff]  ;;  %1234 = vmatpush.bf16.msra.mxu2 %v1225_v29  ;;  %1313 = vmatpush.bf16.msra.mxu3 %v1304_v23  ;;  %v685_v32 = vpop.permute.xlu1 %684 }
 0x158   : > { %1613 = vmatmul.msk.bf16.gmra.mxu2 %vm710_vm2, %v766_v33  ;;  %v1036_v42 = vld [vmem:[#allocation3 + $0x1b] sm:$0xff]  ;;  %1392 = vmatpush.bf16.msra.mxu1 %v1383_v30 }
 0x159   : > { %vm586_vm10 = vcmp.gt.f32.partialorder %v562_v35, 0.0  ;;  %v599_v37 = vmul.f32 0.1, %v562_v35 }
 0x15b   : > { %v612_v39 = vsel %vm586_vm10, %v562_v35, %v599_v37 }
 0x15c   : > { %v703_v40 = vmul.f32 %v665_v38, %v612_v39 }
 0x15d   : > { %v744_v43 = vld [vmem:[#allocation3 + $0x28] sm:$0xff] }
 0x15e   : > { %v1037_v44 = vld [vmem:[#allocation3 + $0x23] sm:$0xff]  ;;  %732 = vst.msk [vmem:[#allocation3 + $0x30] sm:$0xff] %vm710_vm2, %v703_v40  ;;  %v563_v46 = vpop.f32.mrf.mxu1  ;;  %v751_v47 = vpack.c.bf16 %v744_v43, %v743_v41 }
 0x15f   : > { %v1925_v45 = vld [vmem:[#allocation3 + $0x24] sm:$0xff]  ;;  %v1045_v48 = vpack.c.bf16 %v1037_v44, %v1036_v42  ;;  %v564_v50 = vadd.f32 %v1877_v31, %v563_v46 }
 0x160   : > { %v1124_v49 = vpack.c.bf16 %v1925_v45, %v1919_v34  ;;  %1619 = vmatmul.msk.bf16.gmra.mxu3 %vm710_vm2, %v751_v47  ;;  %v759_v55 = vld [vmem:[#allocation3 + $0x21] sm:$0xff] }
 0x161   : > { %1636 = vmatmul.msk.bf16.gmra.mxu1 %vm710_vm2, %v1045_v48  ;;  %vm587_vm11 = vcmp.gt.f32.partialorder %v564_v50, 0.0  ;;  %v600_v51 = vmul.f32 0.1, %v564_v50  ;;  %v1352_v26 = vld [vmem:[#allocation3 + $0x26] sm:$0xff] }
 0x162   : > { %1642 = vmatmul.msk.bf16.gmra.mxu0 %vm710_vm2, %v1124_v49  ;;  %v690_v49 = vpop.permute.xlu2 %689 }
 0x163   : > { %v613_v53 = vsel %vm587_vm11, %v564_v50, %v600_v51 }
 0x164   : > { %v704_v54 = vmul.f32 %v670_v52, %v613_v53 }
 0x165   : > { %v760_v56 = vld [vmem:[#allocation3 + $0x29] sm:$0xff] }
 0x166   : > { %733 = vst.msk [vmem:[#allocation3 + $0x38] sm:$0xff] %vm710_vm2, %v704_v54  ;;  %v566_v57 = vpop.f32.mrf.mxu1  ;;  %v767_v58 = vpack.c.bf16 %v760_v56, %v759_v55  ;;  %v1935_v59 = vld [vmem:[#allocation3 + $0x2c] sm:$0xff] }
 0x167   : > { %v567_v60 = vadd.f32 %v1877_v31, %v566_v57  ;;  %v1203_v61 = vpack.c.bf16 %v1935_v59, %v1925_v45  ;;  %v745_v2 = vld [vmem:[#allocation3 + $0x30] sm:$0xff] }
 0x168   : > { %1614 = vmatmul.msk.bf16.gmra.mxu2 %vm710_vm2, %v767_v58  ;;  %v1038_v3 = vld [vmem:[#allocation3 + $0x2b] sm:$0xff] }
 0x169   : > { %vm588_vm12 = vcmp.gt.f32.partialorder %v567_v60, 0.0  ;;  %v601_v62 = vmul.f32 0.1, %v567_v60  ;;  %v959_v25 = vld [vmem:[#allocation3 + $0x2a] sm:$0xff] }
 0x16b   : > { %v614_v0 = vsel %vm588_vm12, %v567_v60, %v601_v62  ;;  %v695_v62 = vpop.permute.xlu0 %694 }
 0x16c   : > { %v705_v1 = vmul.f32 %v675_v63, %v614_v0  ;;  %v956_v0 = vld [vmem:[#allocation3 + $0x12] sm:$0xff] }
 0x16d   : > { %v746_v4 = vld [vmem:[#allocation3 + $0x38] sm:$0xff] }
 0x16e   : > { %v1039_v5 = vld [vmem:[#allocation3 + $0x33] sm:$0xff]  ;;  %734 = vst.msk [vmem:[#allocation3 + $0x40] sm:$0xff] %vm710_vm2, %v705_v1  ;;  %v568_v7 = vpop.f32.mrf.mxu1  ;;  %v752_v8 = vpack.c.bf16 %v746_v4, %v745_v2  ;;  %v955_v2 = vld [vmem:[#allocation3 + $0xa] sm:$0xff] }
 0x16f   : > { %v1941_v6 = vld [vmem:[#allocation3 + $0x34] sm:$0xff]  ;;  %v1046_v9 = vpack.c.bf16 %v1039_v5, %v1038_v3  ;;  %v569_v11 = vadd.f32 %v1877_v31, %v568_v7  ;;  %v965_v7 = vpack.c.bf16 %v956_v0, %v955_v2 }
 0x170   : > { %v1125_v10 = vpack.c.bf16 %v1941_v6, %v1935_v59  ;;  %1620 = vmatmul.msk.bf16.gmra.mxu3 %vm710_vm2, %v752_v8  ;;  %v761_v16 = vld [vmem:[#allocation3 + $0x31] sm:$0xff] }
 0x171   : > { %1637 = vmatmul.msk.bf16.gmra.mxu1 %vm710_vm2, %v1046_v9  ;;  %vm589_vm14 = vcmp.gt.f32.partialorder %v569_v11, 0.0  ;;  %v602_v12 = vmul.f32 0.1, %v569_v11 }
 0x172   : > { %1643 = vmatmul.msk.bf16.gmra.mxu0 %vm710_vm2, %v1125_v10  ;;  %v876_v10 = vld [vmem:[#allocation3 + $0x2] sm:$0xff] }
 0x173   : > { %v615_v14 = vsel %vm589_vm14, %v569_v11, %v602_v12  ;;  %v886_v11 = vpack.c.bf16 %v955_v2, %v876_v10  ;;  %v958_v12 = vld [vmem:[#allocation3 + $0x22] sm:$0xff]  ;;  %v1274_v10 = vld [vmem:[#allocation3 + $0x2d] sm:$0xff] }
 0x174   : > { %v706_v15 = vmul.f32 %v680_v13, %v615_v14  ;;  %v1351_v13 = vld [vmem:[#allocation3 + $0x1e] sm:$0xff]  ;;  %v888_v29 = vpack.c.bf16 %v959_v25, %v958_v12 }
 0x175   : > { %v762_v17 = vld [vmem:[#allocation3 + $0x39] sm:$0xff] }
 0x176   : > { %735 = vst.msk [vmem:[#allocation3 + $0x48] sm:$0xff] %vm710_vm2, %v706_v15  ;;  %v571_v18 = vpop.f32.mrf.mxu1  ;;  %v768_v20 = vpack.c.bf16 %v762_v17, %v761_v16  ;;  %v1951_v21 = vld [vmem:[#allocation3 + $0x3c] sm:$0xff] }
 0x177   : > { %v572_v22 = vadd.f32 %v1877_v31, %v571_v18  ;;  %v1204_v24 = vpack.c.bf16 %v1951_v21, %v1941_v6  ;;  %v747_v37 = vld [vmem:[#allocation3 + $0x40] sm:$0xff]  ;;  %v1350_v15 = vld [vmem:[#allocation3 + $0x16] sm:$0xff] }
 0x178   : > { %1615 = vmatmul.msk.bf16.gmra.mxu2 %vm710_vm2, %v768_v20  ;;  %v1040_v38 = vld [vmem:[#allocation3 + $0x3b] sm:$0xff]  ;;  %v1360_v17 = vpack.c.bf16 %v1351_v13, %v1350_v15  ;;  %v960_v20 = vld [vmem:[#allocation3 + $0x32] sm:$0xff] }
 0x179   : > { %vm590_vm15 = vcmp.gt.f32.partialorder %v572_v22, 0.0  ;;  %v603_v28 = vmul.f32 0.1, %v572_v22  ;;  %v957_v14 = vld [vmem:[#allocation3 + $0x1a] sm:$0xff]  ;;  %v967_v27 = vpack.c.bf16 %v960_v20, %v959_v25 }
 0x17a   : > { %v966_v16 = vpack.c.bf16 %v958_v12, %v957_v14  ;;  %v887_v18 = vpack.c.bf16 %v957_v14, %v956_v0  ;;  %v1355_v30 = vld [vmem:[#allocation3 + $0x3e] sm:$0xff]  ;;  %v1271_v0 = vld [vmem:[#allocation3 + $0x15] sm:$0xff] }
 0x17b   : > { %v616_v33 = vsel %vm590_vm15, %v572_v22, %v603_v28  ;;  %v1353_v22 = vld [vmem:[#allocation3 + $0x2e] sm:$0xff]  ;;  %v1273_v12 = vld [vmem:[#allocation3 + $0x25] sm:$0xff] }
 0x17c   : > { %v707_v35 = vmul.f32 %v685_v32, %v616_v33  ;;  %v1361_v28 = vpack.c.bf16 %v1353_v22, %v1352_v26  ;;  %v961_v32 = vld [vmem:[#allocation3 + $0x3a] sm:$0xff]  ;;  %v1282_v13 = vpack.c.bf16 %v1274_v10, %v1273_v12 }
 0x17d   : > { %v748_v39 = vld [vmem:[#allocation3 + $0x48] sm:$0xff]  ;;  %v1354_v33 = vld [vmem:[#allocation3 + $0x36] sm:$0xff] }
 0x17e   : > { %v1041_v40 = vld [vmem:[#allocation3 + $0x43] sm:$0xff]  ;;  %736 = vst.msk [vmem:[#allocation3 + $0x50] sm:$0xff] %vm710_vm2, %v707_v35  ;;  %v573_v42 = vpop.f32.mrf.mxu1  ;;  %v753_v43 = vpack.c.bf16 %v748_v39, %v747_v37  ;;  %v1362_v37 = vpack.c.bf16 %v1355_v30, %v1354_v33  ;;  %v889_v39 = vpack.c.bf16 %v961_v32, %v960_v20  ;;  %v1275_v20 = vld [vmem:[#allocation3 + $0x35] sm:$0xff] }
 0x17f   : > { %v1969_v41 = vld [vmem:[#allocation3 + $0x44] sm:$0xff]  ;;  %v1047_v44 = vpack.c.bf16 %v1041_v40, %v1040_v38  ;;  %v574_v47 = vadd.f32 %v1877_v31, %v573_v42 }
 0x180   : > { %v1126_v46 = vpack.c.bf16 %v1969_v41, %v1951_v21  ;;  %1621 = vmatmul.msk.bf16.gmra.mxu3 %vm710_vm2, %v753_v43  ;;  %v763_v52 = vld [vmem:[#allocation3 + $0x41] sm:$0xff] }
 0x181   : > { %1638 = vmatmul.msk.bf16.gmra.mxu1 %vm710_vm2, %v1047_v44  ;;  %vm591_vm0 = vcmp.gt.f32.partialorder %v574_v47, 0.0  ;;  %v604_v48 = vmul.f32 0.1, %v574_v47  ;;  %v962_v23 = vld [vmem:[#allocation3 + $0x42] sm:$0xff] }
 0x182   : > { %1644 = vmatmul.msk.bf16.gmra.mxu0 %vm710_vm2, %v1126_v46  ;;  %v968_v35 = vpack.c.bf16 %v962_v23, %v961_v32  ;;  %v1277_v30 = vld [vmem:[#allocation3 + $0x45] sm:$0xff] }
 0x183   : > { %v617_v50 = vsel %vm591_vm0, %v574_v47, %v604_v48  ;;  %v1356_v48 = vld [vmem:[#allocation3 + $0x46] sm:$0xff] }
 0x184   : > { %v708_v51 = vmul.f32 %v690_v49, %v617_v50 }
 0x185   : > { %v764_v53 = vld [vmem:[#allocation3 + $0x49] sm:$0xff] }
 0x186   : > { %v1978_v54 = vld [vmem:[#allocation3 + $0x4c] sm:$0xff]  ;;  %737 = vst.msk [vmem:[#allocation3 + $0x58] sm:$0xff] %vm710_vm2, %v708_v51  ;;  %v576_v55 = vpop.f32.mrf.mxu1  ;;  %v769_v56 = vpack.c.bf16 %v764_v53, %v763_v52 }
 0x187   : > { %v1205_v57 = vpack.c.bf16 %v1978_v54, %v1969_v41  ;;  %v577_v58 = vadd.f32 %v1877_v31, %v576_v55  ;;  %v1042_v3 = vld [vmem:[#allocation3 + $0x4b] sm:$0xff] }
 0x188   : > { %1616 = vmatmul.msk.bf16.gmra.mxu2 %vm710_vm2, %v769_v56  ;;  %v1357_v44 = vld [vmem:[#allocation3 + $0x4e] sm:$0xff] }
 0x189   : > { %vm592_vm1 = vcmp.gt.f32.partialorder %v577_v58, 0.0  ;;  %v605_v60 = vmul.f32 0.1, %v577_v58  ;;  %v963_v47 = vld [vmem:[#allocation3 + $0x4a] sm:$0xff]  ;;  %v1363_v50 = vpack.c.bf16 %v1357_v44, %v1356_v48 }
 0x18a   : > { %v890_v55 = vpack.c.bf16 %v963_v47, %v962_v23 }
 0x18b   : > { %v618_v63 = vsel %vm592_vm1, %v577_v58, %v605_v60  ;;  %v1272_v60 = vld [vmem:[#allocation3 + $0x1d] sm:$0xff] }
 0x18c   : > { %v709_v1 = vmul.f32 %v695_v62, %v618_v63  ;;  %v1281_v2 = vpack.c.bf16 %v1272_v60, %v1271_v0 }
 0x18d   : > { %v1043_v4 = vld [vmem:[#allocation3 + $0x53] sm:$0xff] }
 0x18e   : > { %v1985_v5 = vld [vmem:[#allocation3 + $0x54] sm:$0xff]  ;;  %738 = vst.msk [vmem:[#allocation3 + $0x60] sm:$0xf] %vm724_vm13, %v709_v1  ;;  %v1048_v8 = vpack.c.bf16 %v1043_v4, %v1042_v3  ;;  %v578_v9 = vpop.f32.mrf.mxu1 }
 0x18f   : > { %v1127_v31 = vpack.c.bf16 %v1985_v5, %v1978_v54  ;;  %v964_v43 = vld [vmem:[#allocation3 + $0x52] sm:$0xff] }
 0x190   : > { %1629 = vmatmul.msk.bf16.vlgmr.msrb.gmra.mxu3 %vm710_vm2, %v965_v7  ;;  %v969_v49 = vpack.c.bf16 %v964_v43, %v963_v47  ;;  %v1358_v1 = vld [vmem:[#allocation3 + $0x56] sm:$0xff] }
 0x191   : > { %1639 = vmatmul.msk.bf16.gmra.mxu1 %vm710_vm2, %v1048_v8 }
 0x192   : > { %1645 = vmatmul.msk.bf16.gmra.mxu0 %vm710_vm2, %v1127_v31 }
 0x195   : > { %v1359_v62 = vld [vmem:[#allocation3 + $0x5e] sm:$0xff] }
 0x196   : > { %v1364_v3 = vpack.c.bf16 %v1359_v62, %v1358_v1 }
 0x198   : > { %1623 = vmatmul.msk.bf16.vlgmr.msrb.gmra.mxu2 %vm710_vm2, %v886_v11 }
 0x1a0   : > { %1630 = vmatmul.msk.bf16.gmra.mxu3 %vm710_vm2, %v966_v16 }
 0x1a1   : > { %1659 = vmatmul.msk.bf16.vlgmr.msra.gmra.mxu1 %vm710_vm2, %v1360_v17 }
 0x1a8   : > { %1624 = vmatmul.msk.bf16.gmra.mxu2 %vm710_vm2, %v887_v18 }
 0x1b0   : > { %1631 = vmatmul.msk.bf16.gmra.mxu3 %vm710_vm2, %v967_v27 }
 0x1b1   : > { %1660 = vmatmul.msk.bf16.gmra.mxu1 %vm710_vm2, %v1361_v28 }
 0x1b8   : > { %1625 = vmatmul.msk.bf16.gmra.mxu2 %vm710_vm2, %v888_v29 }
 0x1c0   : > { %1632 = vmatmul.msk.bf16.gmra.mxu3 %vm710_vm2, %v968_v35 }
 0x1c1   : > { %1661 = vmatmul.msk.bf16.gmra.mxu1 %vm710_vm2, %v1362_v37 }
 0x1c3   : > { %v851_v38 = vpop.f32.mrf.mxu3 }
 0x1c8   : > { %1626 = vmatmul.msk.bf16.gmra.mxu2 %vm710_vm2, %v889_v39 }
 0x1cb   : > { %v799_v40 = vpop.f32.mrf.mxu2  ;;  %v853_v42 = vpop.f32.mrf.mxu3 }
 0x1cc   : > { %v2003_v46 = vadd.f32 %v851_v38, %v799_v40  ;;  %v1279_v40 = vld [vmem:[#allocation3 + $0x55] sm:$0xff] }
 0x1ce   : > { %v2021_v17 = vpop.f32.mrf.mxu1 }
 0x1d0   : > { %1633 = vmatmul.msk.bf16.gmra.mxu3 %vm710_vm2, %v969_v49  ;;  %v1201_v49 = vld [vmem:[#allocation3 + $0x5c] sm:$0xff] }
 0x1d1   : > { %1662 = vmatmul.msk.bf16.gmra.mxu1 %vm710_vm2, %v1363_v50  ;;  %v1206_v54 = vpack.c.bf16 %v1201_v49, %v1985_v5 }
 0x1d3   : > { %v801_v51 = vpop.f32.mrf.mxu2  ;;  %v856_v52 = vpop.f32.mrf.mxu3 }
 0x1d4   : > { %v2007_v53 = vadd.f32 %v853_v42, %v801_v51 }
 0x1d6   : > { %v2028_v25 = vpop.f32.mrf.mxu1 }
 0x1d8   : > { %1627 = vmatmul.msk.bf16.gmra.mxu2 %vm710_vm2, %v890_v55 }
 0x1db   : > { %v804_v56 = vpop.f32.mrf.mxu2  ;;  %v858_v58 = vpop.f32.mrf.mxu3 }
 0x1dc   : > { %v2010_v63 = vadd.f32 %v856_v52, %v804_v56 }
 0x1de   : > { %v2034_v29 = vpop.f32.mrf.mxu1 }
 0x1e0   : > { %1653 = vmatmul.msk.bf16.vlgmr.msra.gmra.mxu3 %vm710_vm2, %v1281_v2 }
 0x1e1   : > { %1663 = vmatmul.msk.bf16.gmra.mxu1 %vm710_vm2, %v1364_v3 }
 0x1e3   : > { %v806_v4 = vpop.f32.mrf.mxu2  ;;  %v861_v7 = vpop.f32.mrf.mxu3 }
 0x1e4   : > { %v2014_v8 = vadd.f32 %v858_v58, %v806_v4 }
 0x1e6   : > { %v2037_v38 = vpop.f32.mrf.mxu1 }
 0x1e8   : > { %1647 = vmatmul.msk.bf16.vlgmr.msra.gmra.mxu2 %vm710_vm2, %v1202_v36  ;;  %v1276_v36 = vld [vmem:[#allocation3 + $0x3d] sm:$0xff] }
 0x1e9   : > { %v1283_v22 = vpack.c.bf16 %v1276_v36, %v1275_v20 }
 0x1eb   : > { %v809_v31 = vpop.f32.mrf.mxu2  ;;  %v863_v9 = vpop.f32.mrf.mxu3 }
 0x1ec   : > { %v862_v11 = vadd.f32 %v861_v7, %v809_v31 }
 0x1ee   : > { %v2044_v44 = vpop.f32.mrf.mxu1 }
 0x1f0   : > { %1654 = vmatmul.msk.bf16.gmra.mxu3 %vm710_vm2, %v1282_v13 }
 0x1f3   : > { %v811_v14 = vpop.f32.mrf.mxu2  ;;  %v866_v15 = vpop.f32.mrf.mxu3 }
 0x1f4   : > { %v864_v16 = vadd.f32 %v863_v9, %v811_v14 }
 0x1f8   : > { %1648 = vmatmul.msk.bf16.gmra.mxu2 %vm710_vm2, %v1203_v61  ;;  %v1278_v61 = vld [vmem:[#allocation3 + $0x4d] sm:$0xff] }
 0x1f9   : > { %v1284_v32 = vpack.c.bf16 %v1278_v61, %v1277_v30 }
 0x1fb   : > { %v814_v19 = vpop.f32.mrf.mxu2  ;;  %v868_v34 = vpop.f32.mrf.mxu3 }
 0x1fc   : > { %v867_v18 = vadd.f32 %v866_v15, %v814_v19 }
 0x200   : > { %1655 = vmatmul.msk.bf16.gmra.mxu3 %vm710_vm2, %v1283_v22 }
 0x203   : > { %v816_v26 = vpop.f32.mrf.mxu2  ;;  %v871_v27 = vpop.f32.mrf.mxu3 }
 0x204   : > { %v869_v28 = vadd.f32 %v868_v34, %v816_v26  ;;  %v1157_v34 = vpop.f32.mrf.mxu0 }
 0x208   : > { %1649 = vmatmul.msk.bf16.gmra.mxu2 %vm710_vm2, %v1204_v24  ;;  %v1280_v24 = vld [vmem:[#allocation3 + $0x5d] sm:$0xff] }
 0x209   : > { %v1285_v43 = vpack.c.bf16 %v1280_v24, %v1279_v40 }
 0x20b   : > { %v819_v45 = vpop.f32.mrf.mxu2  ;;  %v873_v59 = vpop.f32.mrf.mxu3 }
 0x20c   : > { %v872_v23 = vadd.f32 %v871_v27, %v819_v45  ;;  %v1159_v45 = vpop.f32.mrf.mxu0 }
 0x210   : > { %1656 = vmatmul.msk.bf16.gmra.mxu3 %vm710_vm2, %v1284_v32 }
 0x213   : > { %v821_v33 = vpop.f32.mrf.mxu2  ;;  %v999_v35 = vpop.f32.mrf.mxu3 }
 0x214   : > { %v874_v37 = vadd.f32 %v873_v59, %v821_v33 }
 0x218   : > { %1650 = vmatmul.msk.bf16.gmra.mxu2 %vm710_vm2, %v1205_v57  ;;  %v2050_v57 = vpop.f32.mrf.mxu1 }
 0x21b   : > { %v920_v6 = vpop.f32.mrf.mxu2  ;;  %v1001_v21 = vpop.f32.mrf.mxu3 }
 0x21c   : > { %v945_v39 = vadd.f32 %v920_v6, %v2003_v46 }
 0x21e   : > { %v1024_v42 = vadd.f32 %v999_v35, %v945_v39 }
 0x220   : > { %1657 = vmatmul.msk.bf16.gmra.mxu3 %vm710_vm2, %v1285_v43  ;;  %v2053_v60 = vpop.f32.mrf.mxu1  ;;  %v1103_v33 = vadd.f32 %v2021_v17, %v1024_v42 }
 0x222   : > { %v1182_v35 = vadd.f32 %v1157_v34, %v1103_v33 }
 0x223   : > { %v922_v47 = vpop.f32.mrf.mxu2  ;;  %v1004_v48 = vpop.f32.mrf.mxu3 }
 0x224   : > { %v946_v50 = vadd.f32 %v922_v47, %v2007_v53 }
 0x226   : > { %v1025_v41 = vadd.f32 %v1001_v21, %v946_v50 }
 0x228   : > { %1651 = vmatmul.msk.bf16.gmra.mxu2 %vm710_vm2, %v1206_v54  ;;  %v2058_v2 = vpop.f32.mrf.mxu1  ;;  %v1104_v40 = vadd.f32 %v2028_v25, %v1025_v41  ;;  %v1473_v25 = vld [vmem:[#allocation2 + $0xb] sm:$0xff] }
 0x22b   : > { %v925_v46 = vpop.f32.mrf.mxu2  ;;  %v1006_v51 = vpop.f32.mrf.mxu3 }
 0x22c   : > { %v947_v52 = vadd.f32 %v925_v46, %v2010_v63 }
 0x22e   : > { %v1026_v55 = vadd.f32 %v1004_v48, %v947_v52  ;;  %v1183_v48 = vadd.f32 %v1159_v45, %v1104_v40  ;;  %v1476_v40 = vld [vmem:[#allocation2 + $0x23] sm:$0xff] }
 0x230   : > { %v2064_v9 = vpop.f32.mrf.mxu1 }
 0x233   : > { %v927_v56 = vpop.f32.mrf.mxu2  ;;  %v1009_v58 = vpop.f32.mrf.mxu3 }
 0x234   : > { %v948_v62 = vadd.f32 %v927_v56, %v2014_v8 }
 0x236   : > { %v2056_v0 = vadd.f32 %v1006_v51, %v948_v62  ;;  %v1105_v51 = vadd.f32 %v2034_v29, %v1026_v55 }
 0x238   : > { %v2068_v14 = vpop.f32.mrf.mxu1  ;;  %v1106_v29 = vadd.f32 %v2037_v38, %v2056_v0 }
 0x23b   : > { %v930_v53 = vpop.f32.mrf.mxu2  ;;  %v1011_v1 = vpop.f32.mrf.mxu3 }
 0x23c   : > { %v949_v5 = vadd.f32 %v930_v53, %v862_v11 }
 0x23e   : > { %v2060_v3 = vadd.f32 %v1009_v58, %v949_v5 }
 0x240   : > { %v1107_v38 = vadd.f32 %v2044_v44, %v2060_v3 }
 0x243   : > { %v932_v4 = vpop.f32.mrf.mxu2  ;;  %v1014_v7 = vpop.f32.mrf.mxu3 }
 0x244   : > { %v950_v31 = vadd.f32 %v932_v4, %v864_v16  ;;  %v1394_v16 = vpop.f32.mrf.mxu1 }
 0x246   : > { %v2062_v63 = vadd.f32 %v1011_v1, %v950_v31 }
 0x248   : > { %v1108_v44 = vadd.f32 %v2050_v57, %v2062_v63 }
 0x24b   : > { %v935_v10 = vpop.f32.mrf.mxu2  ;;  %v1016_v12 = vpop.f32.mrf.mxu3 }
 0x24c   : > { %v951_v13 = vadd.f32 %v935_v10, %v867_v18  ;;  %v1396_v30 = vpop.f32.mrf.mxu1  ;;  %v1474_v10 = vld [vmem:[#allocation2 + $0x13] sm:$0xff] }
 0x24e   : > { %v2066_v8 = vadd.f32 %v1014_v7, %v951_v13 }
 0x250   : > { %v1109_v57 = vadd.f32 %v2053_v60, %v2066_v8 }
 0x253   : > { %v937_v15 = vpop.f32.mrf.mxu2  ;;  %v1019_v11 = vpop.f32.mrf.mxu3 }
 0x254   : > { %v952_v19 = vadd.f32 %v937_v15, %v869_v28  ;;  %v1162_v28 = vpop.f32.mrf.mxu0  ;;  %v1399_v43 = vpop.f32.mrf.mxu1 }
 0x255   : > { %v1184_v53 = vadd.f32 %v1162_v28, %v1105_v51 }
 0x256   : > { %v2070_v36 = vadd.f32 %v1016_v12, %v952_v19 }
 0x258   : > { %v1110_v60 = vadd.f32 %v2058_v2, %v2070_v36 }
 0x25b   : > { %v940_v20 = vpop.f32.mrf.mxu2  ;;  %v1021_v22 = vpop.f32.mrf.mxu3 }
 0x25c   : > { %v953_v26 = vadd.f32 %v940_v20, %v872_v23  ;;  %v2080_v23 = vld [vmem:[%s2143_s6] ss:$0 sm:$0xff]  ;;  %v1164_v54 = vpop.f32.mrf.mxu0  ;;  %v1401_v58 = vpop.f32.mrf.mxu1 }
 0x25d   : > { %v1185_v19 = vadd.f32 %v1164_v54, %v1106_v29 }
 0x25e   : > { %v2072_v27 = vadd.f32 %v1019_v11, %v953_v26 }
 0x260   : > { %v1111_v2 = vadd.f32 %v2064_v9, %v2072_v27 }
 0x263   : > { %v942_v59 = vpop.f32.mrf.mxu2  ;;  %v1315_v18 = vpop.f32.mrf.mxu3 }
 0x264   : > { %v954_v61 = vadd.f32 %v942_v59, %v874_v37  ;;  %v1167_v55 = vpop.f32.mrf.mxu0  ;;  %v1404_v26 = vpop.f32.mrf.mxu1  ;;  %v1475_v59 = vld [vmem:[#allocation2 + $0x1b] sm:$0xff] }
 0x265   : > { %v1186_v28 = vadd.f32 %v1167_v55, %v1107_v38 }
 0x266   : > { %v2074_v32 = vadd.f32 %v1021_v22, %v954_v61 }
 0x268   : > { %v1112_v9 = vadd.f32 %v2068_v14, %v2074_v32 }
 0x26b   : > { %v1236_v6 = vpop.f32.mrf.mxu2  ;;  %v1317_v21 = vpop.f32.mrf.mxu3 }
 0x26c   : > { %v1261_v24 = vadd.f32 %v1236_v6, %v1182_v35  ;;  %v1406_v3 = vpop.f32.mrf.mxu1 }
 0x26e   : > { %v1340_v39 = vadd.f32 %v1315_v18, %v1261_v24 }
 0x270   : > { %v1419_v37 = vadd.f32 %v1394_v16, %v1340_v39 }
 0x272   : > { %v1433_v47 = vadd.f32 %v2080_v23, %v1419_v37 }
 0x273   : > { %v1238_v17 = vpop.f32.mrf.mxu2  ;;  %v1320_v42 = vpop.f32.mrf.mxu3 }
 0x274   : > { %vm1443_vm2 = vcmp.gt.f32.partialorder %v1433_v47, 0.0  ;;  %v1453_v49 = vmul.f32 0.1, %v1433_v47  ;;  %v1262_v50 = vadd.f32 %v1238_v17, %v1183_v48 }
 0x276   : > { %v1463_v46 = vsel %vm1443_vm2, %v1433_v47, %v1453_v49  ;;  %v1341_v41 = vadd.f32 %v1317_v21, %v1262_v50 }
 0x277   : > { %v1483_v52 = vadd.f32 %v1473_v25, %v1463_v46  ;;  %v1477_v25 = vld [vmem:[#allocation2 + $0x2b] sm:$0xff] }
 0x278   : > { %v1420_v56 = vadd.f32 %v1396_v30, %v1341_v41  ;;  %v1169_v30 = vpop.f32.mrf.mxu0 }
 0x279   : > { %1493 = vst.msk [vmem:[%s2088_s12] sm:$0xff] %vm485_vm4, %v1483_v52  ;;  %v1187_v17 = vadd.f32 %v1169_v30, %v1108_v44 }
 0x27a   : > { %v1434_v62 = vadd.f32 %v2080_v23, %v1420_v56  ;;  %v1409_v56 = vpop.f32.mrf.mxu1 }
 0x27b   : > { %v1241_v1 = vpop.f32.mrf.mxu2  ;;  %v1322_v5 = vpop.f32.mrf.mxu3 }
 0x27c   : > { %vm1444_vm3 = vcmp.gt.f32.partialorder %v1434_v62, 0.0  ;;  %v1454_v4 = vmul.f32 0.1, %v1434_v62  ;;  %v1263_v7 = vadd.f32 %v1241_v1, %v1184_v53 }
 0x27e   : > { %v1464_v31 = vsel %vm1444_vm3, %v1434_v62, %v1454_v4  ;;  %v1342_v12 = vadd.f32 %v1320_v42, %v1263_v7 }
 0x27f   : > { %v1484_v13 = vadd.f32 %v1474_v10, %v1464_v31  ;;  %v1478_v31 = vld [vmem:[#allocation2 + $0x33] sm:$0xff] }
 0x280   : > { %v1421_v15 = vadd.f32 %v1399_v43, %v1342_v12  ;;  %v1172_v42 = vpop.f32.mrf.mxu0 }
 0x281   : > { %1494 = vst.msk [vmem:[%s2088_s12 + $0x8] sm:$0xff] %vm485_vm4, %v1484_v13  ;;  %v1188_v62 = vadd.f32 %v1172_v42, %v1109_v57 }
 0x282   : > { %v1435_v11 = vadd.f32 %v2080_v23, %v1421_v15  ;;  %v1411_v15 = vpop.f32.mrf.mxu1 }
 0x283   : > { %v1243_v34 = vpop.f32.mrf.mxu2  ;;  %v1325_v20 = vpop.f32.mrf.mxu3 }
 0x284   : > { %vm1445_vm5 = vcmp.gt.f32.partialorder %v1435_v11, 0.0  ;;  %v1455_v22 = vmul.f32 0.1, %v1435_v11  ;;  %v1264_v16 = vadd.f32 %v1243_v34, %v1185_v19 }
 0x286   : > { %v1465_v45 = vsel %vm1445_vm5, %v1435_v11, %v1455_v22  ;;  %v1343_v18 = vadd.f32 %v1322_v5, %v1264_v16  ;;  %v1479_v22 = vld [vmem:[#allocation2 + $0x3b] sm:$0xff] }
 0x287   : > { %v1485_v0 = vadd.f32 %v1475_v59, %v1465_v45 }
 0x288   : > { %v1422_v61 = vadd.f32 %v1401_v58, %v1343_v18  ;;  %v1174_v4 = vpop.f32.mrf.mxu0 }
 0x289   : > { %1495 = vst.msk [vmem:[%s2088_s12 + $0x10] sm:$0xff] %vm485_vm4, %v1485_v0  ;;  %v1189_v13 = vadd.f32 %v1174_v4, %v1110_v60 }
 0x28a   : > { %v1436_v33 = vadd.f32 %v2080_v23, %v1422_v61 }
 0x28b   : > { %v1246_v35 = vpop.f32.mrf.mxu2  ;;  %v1327_v24 = vpop.f32.mrf.mxu3 }
 0x28c   : > { %vm1446_vm6 = vcmp.gt.f32.partialorder %v1436_v33, 0.0  ;;  %v1456_v6 = vmul.f32 0.1, %v1436_v33  ;;  %v1265_v21 = vadd.f32 %v1246_v35, %v1186_v28  ;;  %v1480_v35 = vld [vmem:[#allocation2 + $0x43] sm:$0xff] }
 0x28e   : > { %v1466_v39 = vsel %vm1446_vm6, %v1436_v33, %v1456_v6  ;;  %v1344_v43 = vadd.f32 %v1325_v20, %v1265_v21  ;;  %v1414_v33 = vpop.f32.mrf.mxu1 }
 0x28f   : > { %v1486_v37 = vadd.f32 %v1476_v40, %v1466_v39 }
 0x290   : > { %v1423_v47 = vadd.f32 %v1404_v26, %v1344_v43  ;;  %v1177_v36 = vpop.f32.mrf.mxu0 }
 0x291   : > { %1496 = vst.msk [vmem:[%s2088_s12 + $0x18] sm:$0xff] %vm485_vm4, %v1486_v37  ;;  %v1190_v18 = vadd.f32 %v1177_v36, %v1111_v2 }
 0x292   : > { %v1437_v48 = vadd.f32 %v2080_v23, %v1423_v47 }
 0x293   : > { %v1248_v49 = vpop.f32.mrf.mxu2  ;;  %v1330_v51 = vpop.f32.mrf.mxu3 }
 0x294   : > { %vm1447_vm7 = vcmp.gt.f32.partialorder %v1437_v48, 0.0  ;;  %v1457_v50 = vmul.f32 0.1, %v1437_v48  ;;  %v1266_v54 = vadd.f32 %v1248_v49, %v1187_v17 }
 0x296   : > { %v1467_v46 = vsel %vm1447_vm7, %v1437_v48, %v1457_v50  ;;  %v1345_v41 = vadd.f32 %v1327_v24, %v1266_v54  ;;  %v1481_v48 = vld [vmem:[#allocation2 + $0x4b] sm:$0xff]  ;;  %v1416_v42 = vpop.f32.mrf.mxu1 }
 0x297   : > { %v1487_v63 = vadd.f32 %v1477_v25, %v1467_v46  ;;  %v1482_v46 = vld [vmem:[#allocation2 + $0x53] sm:$0xff] }
 0x298   : > { %v1424_v52 = vadd.f32 %v1406_v3, %v1345_v41  ;;  %v1179_v24 = vpop.f32.mrf.mxu0 }
 0x299   : > { %1497 = vst.msk [vmem:[%s2088_s12 + $0x20] sm:$0xff] %vm485_vm4, %v1487_v63  ;;  %v1191_v40 = vadd.f32 %v1179_v24, %v1112_v9 }
 0x29a   : > { %v1438_v58 = vadd.f32 %v2080_v23, %v1424_v52 }
 0x29b   : > { %v1251_v53 = vpop.f32.mrf.mxu2  ;;  %v1332_v29 = vpop.f32.mrf.mxu3 }
 0x29c   : > { %vm1448_vm8 = vcmp.gt.f32.partialorder %v1438_v58, 0.0  ;;  %v1458_v1 = vmul.f32 0.1, %v1438_v58  ;;  %v1267_v5 = vadd.f32 %v1251_v53, %v1188_v62 }
 0x29e   : > { %v1468_v7 = vsel %vm1448_vm8, %v1438_v58, %v1458_v1  ;;  %v1346_v10 = vadd.f32 %v1330_v51, %v1267_v5 }
 0x29f   : > { %v1488_v8 = vadd.f32 %v1478_v31, %v1468_v7 }
 0x2a0   : > { %v1425_v12 = vadd.f32 %v1409_v56, %v1346_v10 }
 0x2a1   : > { %1498 = vst.msk [vmem:[%s2088_s12 + $0x28] sm:$0xff] %vm485_vm4, %v1488_v8 }
 0x2a2   : > { %v1439_v55 = vadd.f32 %v2080_v23, %v1425_v12 }
 0x2a3   : > { %v1253_v11 = vpop.f32.mrf.mxu2  ;;  %v1335_v38 = vpop.f32.mrf.mxu3 }
 0x2a4   : > { %vm1449_vm9 = vcmp.gt.f32.partialorder %v1439_v55, 0.0  ;;  %v1459_v19 = vmul.f32 0.1, %v1439_v55  ;;  %v1268_v34 = vadd.f32 %v1253_v11, %v1189_v13 }
 0x2a6   : > { %v1469_v20 = vsel %vm1449_vm9, %v1439_v55, %v1459_v19  ;;  %v1347_v16 = vadd.f32 %v1332_v29, %v1268_v34 }
 0x2a7   : > { %v1489_v26 = vadd.f32 %v1479_v22, %v1469_v20 }
 0x2a8   : > { %v1426_v45 = vadd.f32 %v1411_v15, %v1347_v16 }
 0x2a9   : > { %1499 = vst.msk [vmem:[%s2088_s12 + $0x30] sm:$0xff] %vm485_vm4, %v1489_v26 }
 0x2aa   : > { %v1440_v59 = vadd.f32 %v2080_v23, %v1426_v45 }
 0x2ab   : > { %v1256_v0 = vpop.f32.mrf.mxu2  ;;  %v1337_v37 = vpop.f32.mrf.mxu3 }
 0x2ac   : > { %vm1450_vm10 = vcmp.gt.f32.partialorder %v1440_v59, 0.0  ;;  %v1460_v61 = vmul.f32 0.1, %v1440_v59  ;;  %v1269_v30 = vadd.f32 %v1256_v0, %v1190_v18 }
 0x2ae   : > { %v1470_v28 = vsel %vm1450_vm10, %v1440_v59, %v1460_v61  ;;  %v1348_v6 = vadd.f32 %v1335_v38, %v1269_v30 }
 0x2af   : > { %v1490_v27 = vadd.f32 %v1480_v35, %v1470_v28 }
 0x2b0   : > { %v1427_v21 = vadd.f32 %v1414_v33, %v1348_v6 }
 0x2b1   : > { %1500 = vst.msk [vmem:[%s2088_s12 + $0x38] sm:$0xff] %vm485_vm4, %v1490_v27 }
 0x2b2   : > { %v1441_v39 = vadd.f32 %v2080_v23, %v1427_v21 }
 0x2b3   : > { %v1258_v43 = vpop.f32.mrf.mxu2 }
 0x2b4   : > { %vm1451_vm11 = vcmp.gt.f32.partialorder %v1441_v39, 0.0  ;;  %v1461_v44 = vmul.f32 0.1, %v1441_v39  ;;  %v1270_v3 = vadd.f32 %v1258_v43, %v1191_v40 }
 0x2b6   : > { %v1471_v47 = vsel %vm1451_vm11, %v1441_v39, %v1461_v44  ;;  %v1349_v17 = vadd.f32 %v1337_v37, %v1270_v3 }
 0x2b7   : > { %v1491_v14 = vadd.f32 %v1481_v48, %v1471_v47 }
 0x2b8   : > { %v1428_v32 = vadd.f32 %v1416_v42, %v1349_v17 }
 0x2b9   : > { %1501 = vst.msk [vmem:[%s2088_s12 + $0x40] sm:$0xff] %vm485_vm4, %v1491_v14 }
 0x2ba   : > { %v1442_v49 = vadd.f32 %v2080_v23, %v1428_v32 }
 0x2bc   : > { %vm1452_vm12 = vcmp.gt.f32.partialorder %v1442_v49, 0.0  ;;  %v1462_v50 = vmul.f32 0.1, %v1442_v49 }
 0x2be   : > { %v1472_v54 = vsel %vm1452_vm12, %v1442_v49, %v1462_v50 }
 0x2bf   : > { %v1492_v25 = vadd.f32 %v1482_v46, %v1472_v54 }
 0x2c1   : > { %1502 = vst.msk [vmem:[%s2088_s12 + $0x48] sm:$0xff] %vm485_vm4, %v1492_v25 }
 0x2c2 PF: > { %s18_s27 = sadd.s32 1, %s1699_s27  }
 0x2c3   : > { %p15_p4 = scmp.ge.s32.totalorder %s18_s27, 4  }
 0x2c5   :  { %17 = sbr.rel (!%p15_p4) target bundleno = 1 (0x1), region = 90 }

</bundles_post_ra>
